<compile_context>
chip_gen: v7x
topology: tpu7x:2x2x1
jax: 0.10.0
libtpu: 0.0.40
codegen_flags: <defaults>
</compile_context>

<pallas_src>
import math

import jax
import jax.numpy as jnp
from jax import lax
from jax.experimental import pallas as pl
from jax.experimental.pallas import tpu as pltpu

# ----------------------------- tiny "config" (synthetic BERT) -----------------------------
BATCH = 2
SEQ = 8
HIDDEN = 32          # config.bert_dim
N_HEADS = 2
HEAD_DIM = HIDDEN // N_HEADS
INTERMEDIATE = 64
N_LAYERS = 2
VOCAB = 64
MAX_POS = 16
LABEL_NUM = 4        # config.label_num
LN_EPS = 1e-12       # BERT layernorm eps
ATTN_SCALE = 1.0 / math.sqrt(HEAD_DIM)
INV_SQRT2 = 1.0 / math.sqrt(2.0)

# NOTE: shapes here are toy (H=32, S=8, dh=16 all < 128 lanes).  For real BERT dims
# the block last-dims should be multiples of 128 and the M axis tiled/"parallel".


# ----------------------------------- in-kernel helpers ------------------------------------
def _layernorm(x, g, b):
    mu = jnp.mean(x, axis=-1, keepdims=True)
    var = jnp.mean((x - mu) * (x - mu), axis=-1, keepdims=True)
    return (x - mu) * lax.rsqrt(var + LN_EPS) * g + b


def _gelu(x):
    # exact (erf-based) GELU, as used by BERT; fp32, erf goes to the EUP
    return 0.5 * x * (1.0 + lax.erf(x * INV_SQRT2))


# ------------------------------------ fused kernel -----------------------------------------
def _bert_fused_kernel(
    x_emb_ref, addmask_ref, emb_g_ref, emb_b_ref,
    wqkv_ref, bqkv_ref, wo_ref, bo_ref, ln1g_ref, ln1b_ref,
    wi_ref, bi_ref, wf_ref, bf_ref, ln2g_ref, ln2b_ref,
    fcw_ref, fcb_ref,
    out_ref,
    x_sc,
):
    layer = pl.program_id(0)

    # ---- layer 0: embedding LayerNorm into the resident activation scratch ----
    @pl.when(layer == 0)
    def _init():
        out_ref[...] = jnp.zeros_like(out_ref)
        x_sc[...] = _layernorm(x_emb_ref[...], emb_g_ref[...], emb_b_ref[...])

    x = x_sc[...]                                   # (B*S, H) fp32, resident in VMEM
    x16 = x.astype(jnp.bfloat16)

    # ---- fused Q/K/V projection: one [B*S, H] @ [H, 3H] matmul ----
    qkv = jnp.dot(x16, wqkv_ref[...], preferred_element_type=jnp.float32) + bqkv_ref[...]
    qkv16 = qkv.astype(jnp.bfloat16)

    addmask = addmask_ref[...]                      # (B, S) additive mask, precomputed

    # ---- multi-head attention: static unroll over (batch, head), no relayouts ----
    batch_rows = []
    for b in range(BATCH):
        amask = addmask[b:b + 1, :]                 # (1, S) -> broadcast over query rows
        r0, r1 = b * SEQ, (b + 1) * SEQ
        head_cols = []
        for h in range(N_HEADS):
            c0 = h * HEAD_DIM
            q = qkv16[r0:r1, c0:c0 + HEAD_DIM]
            k = qkv16[r0:r1, HIDDEN + c0:HIDDEN + c0 + HEAD_DIM]
            v = qkv16[r0:r1, 2 * HIDDEN + c0:2 * HIDDEN + c0 + HEAD_DIM]
            # q @ k^T without materializing a transpose
            s = lax.dot_general(q, k, (((1,), (1,)), ((), ())),
                                preferred_element_type=jnp.float32) * ATTN_SCALE
            s = s + amask
            s = s - jnp.max(s, axis=-1, keepdims=True)
            p = jnp.exp(s)                          # fp32 softmax numerator
            inv = pl.reciprocal(jnp.sum(p, axis=-1, keepdims=True), approx=True)
            ctx_h = jnp.dot(p.astype(jnp.bfloat16), v,
                            preferred_element_type=jnp.float32) * inv
            head_cols.append(ctx_h)
        batch_rows.append(jnp.concatenate(head_cols, axis=-1))
    ctx = jnp.concatenate(batch_rows, axis=0)       # (B*S, H) fp32

    # ---- output projection fused with residual + LayerNorm ----
    attn_out = jnp.dot(ctx.astype(jnp.bfloat16), wo_ref[...],
                       preferred_element_type=jnp.float32) + bo_ref[...]
    x = _layernorm(attn_out + x, ln1g_ref[...], ln1b_ref[...])

    # ---- FFN (dense + GELU, dense) fused with residual + LayerNorm ----
    h1 = jnp.dot(x.astype(jnp.bfloat16), wi_ref[...],
                 preferred_element_type=jnp.float32) + bi_ref[...]
    h1 = _gelu(h1)
    ffn = jnp.dot(h1.astype(jnp.bfloat16), wf_ref[...],
                  preferred_element_type=jnp.float32) + bf_ref[...]
    x = _layernorm(ffn + x, ln2g_ref[...], ln2b_ref[...])

    x_sc[...] = x                                   # carry activations to next layer

    # ---- last layer: CLS -> dropout(eval = identity) -> Linear -> log_softmax ----
    @pl.when(layer == pl.num_programs(0) - 1)
    def _finalize():
        # gather the CLS (token 0) row of every batch element, then one matmul
        cls = jnp.concatenate([x[b * SEQ:b * SEQ + 1, :] for b in range(BATCH)],
                              axis=0)               # (B, H) fp32
        logits = jnp.dot(cls, fcw_ref[...],
                         preferred_element_type=jnp.float32) + fcb_ref[...]
        sh = logits - jnp.max(logits, axis=-1, keepdims=True)
        out_ref[...] = sh - jnp.log(jnp.sum(jnp.exp(sh), axis=-1, keepdims=True))


# --------------------------------- pallas_call wrapper -------------------------------------
def bert_classification_forward(params, input_ids, mask):
    B, S = input_ids.shape
    assert B == BATCH and S == SEQ

    # embeddings (token + position + token_type=0) -- gather is plain-JAX glue
    x = (params["word_emb"][input_ids]
         + params["pos_emb"][:S][None, :, :]
         + params["type_emb"][0][None, None, :])
    x = x.reshape(B * S, HIDDEN).astype(jnp.float32)

    # additive attention mask computed ONCE (1 = keep, 0 = pad)
    addmask = ((1.0 - mask.astype(jnp.float32)) * -10000.0)

    H, I, L = HIDDEN, INTERMEDIATE, LABEL_NUM
    full2d = lambda shape: pl.BlockSpec(shape, lambda l: (0, 0))
    perlayer = lambda shape: pl.BlockSpec((None,) + shape, lambda l: (l, 0, 0))

    in_specs = [
        full2d((B * S, H)),        # x_emb
        full2d((B, S)),            # additive mask
        full2d((1, H)),            # emb_ln_g
        full2d((1, H)),            # emb_ln_b
        perlayer((H, 3 * H)),      # wqkv (bf16)
        perlayer((1, 3 * H)),      # bqkv
        perlayer((H, H)),          # wo (bf16)
        perlayer((1, H)),          # bo
        perlayer((1, H)),          # ln1_g
        perlayer((1, H)),          # ln1_b
        perlayer((H, I)),          # wi (bf16)
        perlayer((1, I)),          # bi
        perlayer((I, H)),          # wf (bf16)
        perlayer((1, H)),          # bf
        perlayer((1, H)),          # ln2_g
        perlayer((1, H)),          # ln2_b
        full2d((H, L)),            # fc_w
        full2d((1, L)),            # fc_b
    ]

    return pl.pallas_call(
        _bert_fused_kernel,
        out_shape=jax.ShapeDtypeStruct((B, L), jnp.float32),
        grid=(N_LAYERS,),
        in_specs=in_specs,
        out_specs=pl.BlockSpec((B, L), lambda l: (0, 0)),
        scratch_shapes=[pltpu.VMEM((B * S, HIDDEN), jnp.float32)],
        compiler_params=pltpu.CompilerParams(
            # layer axis is a sequential carry through the VMEM scratch
            dimension_semantics=("arbitrary",)),
    )(x, addmask,
      params["emb_ln_g"], params["emb_ln_b"],
      params["wqkv"], params["bqkv"], params["wo"], params["bo"],
      params["ln1_g"], params["ln1_b"],
      params["wi"], params["bi"], params["wf"], params["bf"],
      params["ln2_g"], params["ln2_b"],
      params["fc_w"], params["fc_b"])


# ------------------------------- pure-JAX reference (check) --------------------------------
def reference_forward(params, input_ids, mask):
    B, S = input_ids.shape
    x = (params["word_emb"][input_ids]
         + params["pos_emb"][:S][None, :, :]
         + params["type_emb"][0][None, None, :])
    x = x.reshape(B * S, HIDDEN).astype(jnp.float32)

    def ln(x, g, b):
        mu = x.mean(-1, keepdims=True)
        var = ((x - mu) ** 2).mean(-1, keepdims=True)
        return (x - mu) * lax.rsqrt(var + LN_EPS) * g + b

    x = ln(x, params["emb_ln_g"], params["emb_ln_b"])
    addmask = (1.0 - mask.astype(jnp.float32)) * -10000.0

    def split_heads(t):
        return t.reshape(B, S, N_HEADS, HEAD_DIM).transpose(0, 2, 1, 3)

    for l in range(N_LAYERS):
        qkv = x @ params["wqkv"][l].astype(jnp.float32) + params["bqkv"][l]
        q, k, v = jnp.split(qkv, 3, axis=-1)
        qh, kh, vh = split_heads(q), split_heads(k), split_heads(v)
        s = jnp.einsum("bhqd,bhkd->bhqk", qh, kh) * ATTN_SCALE
        s = s + addmask[:, None, None, :]
        p = jax.nn.softmax(s, axis=-1)
        ctx = jnp.einsum("bhqk,bhkd->bhqd", p, vh).transpose(0, 2, 1, 3).reshape(B * S, HIDDEN)
        attn = ctx @ params["wo"][l].astype(jnp.float32) + params["bo"][l]
        x = ln(attn + x, params["ln1_g"][l], params["ln1_b"][l])
        h1 = x @ params["wi"][l].astype(jnp.float32) + params["bi"][l]
        h1 = 0.5 * h1 * (1.0 + lax.erf(h1 * INV_SQRT2))
        ffn = h1 @ params["wf"][l].astype(jnp.float32) + params["bf"][l]
        x = ln(ffn + x, params["ln2_g"][l], params["ln2_b"][l])

    cls = x.reshape(B, S, HIDDEN)[:, 0, :]
    logits = cls @ params["fc_w"] + params["fc_b"]
    return jax.nn.log_softmax(logits, axis=-1)


# ------------------------------------ parameter init ---------------------------------------
def init_params(key):
    keys = iter(jax.random.split(key, 8 + 4 * N_LAYERS))

    def normal(shape):
        return (0.02 * jax.random.normal(next(keys), shape)).astype(jnp.float32)

    params = {
        "word_emb": normal((VOCAB, HIDDEN)),
        "pos_emb": normal((MAX_POS, HIDDEN)),
        "type_emb": normal((2, HIDDEN)),
        "emb_ln_g": jnp.ones((1, HIDDEN), jnp.float32),
        "emb_ln_b": jnp.zeros((1, HIDDEN), jnp.float32),
        "fc_w": normal((HIDDEN, LABEL_NUM)),
        "fc_b": jnp.zeros((1, LABEL_NUM), jnp.float32),
    }

    wqkv, wo, wi, wf = [], [], [], []
    for _ in range(N_LAYERS):
        wqkv.append(normal((HIDDEN, 3 * HIDDEN)))   # fused Q|K|V projection
        wo.append(normal((HIDDEN, HIDDEN)))
        wi.append(normal((HIDDEN, INTERMEDIATE)))
        wf.append(normal((INTERMEDIATE, HIDDEN)))

    # stacked per-layer weights; big matrices in bf16 (MXU path, half HBM traffic)
    params.update({
        "wqkv": jnp.stack(wqkv).astype(jnp.bfloat16),
        "bqkv": jnp.zeros((N_LAYERS, 1, 3 * HIDDEN), jnp.float32),
        "wo": jnp.stack(wo).astype(jnp.bfloat16),
        "bo": jnp.zeros((N_LAYERS, 1, HIDDEN), jnp.float32),
        "ln1_g": jnp.ones((N_LAYERS, 1, HIDDEN), jnp.float32),
        "ln1_b": jnp.zeros((N_LAYERS, 1, HIDDEN), jnp.float32),
        "wi": jnp.stack(wi).astype(jnp.bfloat16),
        "bi": jnp.zeros((N_LAYERS, 1, INTERMEDIATE), jnp.float32),
        "wf": jnp.stack(wf).astype(jnp.bfloat16),
        "bf": jnp.zeros((N_LAYERS, 1, HIDDEN), jnp.float32),
        "ln2_g": jnp.ones((N_LAYERS, 1, HIDDEN), jnp.float32),
        "ln2_b": jnp.zeros((N_LAYERS, 1, HIDDEN), jnp.float32),
    })
    return params


# ----------------------------------------- main ---------------------------------------------
if __name__ == "__main__":
    root = jax.random.PRNGKey(0)
    k_params, k_ids = jax.random.split(root)

    params = init_params(k_params)

    input_ids = jax.random.randint(k_ids, (BATCH, SEQ), 0, VOCAB, dtype=jnp.int32)
    # attention mask: batch 0 fully valid, batch 1 has the last two tokens padded
    mask = jnp.ones((BATCH, SEQ), jnp.float32).at[1, -2:].set(0.0)

    fwd = jax.jit(bert_classification_forward)
    out = fwd(params, input_ids, mask)
    out = jax.block_until_ready(out)

    assert out.shape == (BATCH, LABEL_NUM)
    assert bool(jnp.all(jnp.isfinite(out)))
    # rows of exp(log_softmax) must sum to 1
    assert bool(jnp.allclose(jnp.sum(jnp.exp(out), axis=-1), 1.0, atol=1e-5))
    # match a pure-JAX fp32 reference using the same (bf16-rounded) weights
    ref = reference_forward(params, input_ids, mask)
    assert bool(jnp.allclose(out, ref, atol=5e-2)), (out, ref)

    # TODO(synk): loading real pretrained BERT weights / train-mode dropout RNG are out of
    # scope for this self-contained script (eval-mode dropout is the identity).
    print("KERNEL_OK")
</pallas_src>

<mosaic_0001>
module attributes {stable_mosaic.version = 11 : i64} {
  func.func @_bert_fused_kernel(%arg0: i32, %arg1: memref<16x32xf32, #tpu.memory_space<vmem>>, %arg2: memref<2x8xf32, #tpu.memory_space<vmem>>, %arg3: memref<1x32xf32, #tpu.memory_space<vmem>>, %arg4: memref<1x32xf32, #tpu.memory_space<vmem>>, %arg5: memref<1x32x96xbf16, #tpu.memory_space<vmem>>, %arg6: memref<1x1x96xf32, #tpu.memory_space<vmem>>, %arg7: memref<1x32x32xbf16, #tpu.memory_space<vmem>>, %arg8: memref<1x1x32xf32, #tpu.memory_space<vmem>>, %arg9: memref<1x1x32xf32, #tpu.memory_space<vmem>>, %arg10: memref<1x1x32xf32, #tpu.memory_space<vmem>>, %arg11: memref<1x32x64xbf16, #tpu.memory_space<vmem>>, %arg12: memref<1x1x64xf32, #tpu.memory_space<vmem>>, %arg13: memref<1x64x32xbf16, #tpu.memory_space<vmem>>, %arg14: memref<1x1x32xf32, #tpu.memory_space<vmem>>, %arg15: memref<1x1x32xf32, #tpu.memory_space<vmem>>, %arg16: memref<1x1x32xf32, #tpu.memory_space<vmem>>, %arg17: memref<32x4xf32, #tpu.memory_space<vmem>>, %arg18: memref<1x4xf32, #tpu.memory_space<vmem>>, %arg19: memref<2x4xf32, #tpu.memory_space<vmem>>, %arg20: memref<16x32xf32, #tpu.memory_space<vmem>>) attributes {dimension_semantics = [#tpu.dimension_semantics<arbitrary>], iteration_bounds = array<i64: 2>, scalar_prefetch = 0 : i64, scratch_operands = 1 : i64, tpu.core_type = #tpu.core_type<tc>, window_params = [{pipeline_mode = #tpu.pipeline_mode<synchronous>, transform_indices = @transform_0, window_bounds = array<i64: 16, 32>}, {pipeline_mode = #tpu.pipeline_mode<synchronous>, transform_indices = @transform_1, window_bounds = array<i64: 2, 8>}, {pipeline_mode = #tpu.pipeline_mode<synchronous>, transform_indices = @transform_2, window_bounds = array<i64: 1, 32>}, {pipeline_mode = #tpu.pipeline_mode<synchronous>, transform_indices = @transform_3, window_bounds = array<i64: 1, 32>}, {transform_indices = @transform_4, window_bounds = array<i64: 1, 32, 96>}, {transform_indices = @transform_5, window_bounds = array<i64: 1, 1, 96>}, {transform_indices = @transform_6, window_bounds = array<i64: 1, 32, 32>}, {transform_indices = @transform_7, window_bounds = array<i64: 1, 1, 32>}, {transform_indices = @transform_8, window_bounds = array<i64: 1, 1, 32>}, {transform_indices = @transform_9, window_bounds = array<i64: 1, 1, 32>}, {transform_indices = @transform_10, window_bounds = array<i64: 1, 32, 64>}, {transform_indices = @transform_11, window_bounds = array<i64: 1, 1, 64>}, {transform_indices = @transform_12, window_bounds = array<i64: 1, 64, 32>}, {transform_indices = @transform_13, window_bounds = array<i64: 1, 1, 32>}, {transform_indices = @transform_14, window_bounds = array<i64: 1, 1, 32>}, {transform_indices = @transform_15, window_bounds = array<i64: 1, 1, 32>}, {pipeline_mode = #tpu.pipeline_mode<synchronous>, transform_indices = @transform_16, window_bounds = array<i64: 32, 4>}, {pipeline_mode = #tpu.pipeline_mode<synchronous>, transform_indices = @transform_17, window_bounds = array<i64: 1, 4>}, {pipeline_mode = #tpu.pipeline_mode<synchronous>, transform_indices = @transform_18, window_bounds = array<i64: 2, 4>}]} {
    %c0_i32 = arith.constant 0 : i32
    %0 = arith.cmpi eq, %arg0, %c0_i32 : i32
    %1 = arith.extui %0 : i1 to i32
    %c0_i32_0 = arith.constant 0 : i32
    %2 = arith.cmpi ne, %1, %c0_i32_0 : i32
    scf.if %2 {
      %cst_79 = arith.constant 0.000000e+00 : f32
      %193 = vector.broadcast %cst_79 : f32 to vector<2x4xf32>
      %c0_80 = arith.constant 0 : index
      %c0_81 = arith.constant 0 : index
      %194 = vector.load %arg19[%c0_80, %c0_81] : memref<2x4xf32, #tpu.memory_space<vmem>>, vector<2x4xf32>
      tpu.vector_store %arg19[%c0_80, %c0_81], %193 {strides = array<i32>} : memref<2x4xf32, #tpu.memory_space<vmem>>, vector<2x4xf32>,
      %c0_82 = arith.constant 0 : index
      %c0_83 = arith.constant 0 : index
      %195 = vector.load %arg1[%c0_82, %c0_83] : memref<16x32xf32, #tpu.memory_space<vmem>>, vector<16x32xf32>
      %c0_84 = arith.constant 0 : index
      %c0_85 = arith.constant 0 : index
      %196 = vector.load %arg3[%c0_84, %c0_85] : memref<1x32xf32, #tpu.memory_space<vmem>>, vector<1x32xf32>
      %c0_86 = arith.constant 0 : index
      %c0_87 = arith.constant 0 : index
      %197 = vector.load %arg4[%c0_86, %c0_87] : memref<1x32xf32, #tpu.memory_space<vmem>>, vector<1x32xf32>
      %cst_88 = arith.constant dense<0.000000e+00> : vector<16xf32>
      %198 = vector.multi_reduction <add>, %195, %cst_88 [1] : vector<16x32xf32> to vector<16xf32>
      %199 = vector.shape_cast %198 : vector<16xf32> to vector<16x1xf32>
      %cst_89 = arith.constant 3.200000e+01 : f32
      %200 = vector.broadcast %cst_89 : f32 to vector<16x1xf32>
      %201 = arith.divf %199, %200 : vector<16x1xf32>
      %202 = vector.broadcast %201 : vector<16x1xf32> to vector<16x32xf32>
      %203 = arith.subf %195, %202 : vector<16x32xf32>
      %204 = vector.broadcast %201 : vector<16x1xf32> to vector<16x32xf32>
      %205 = arith.subf %195, %204 : vector<16x32xf32>
      %206 = arith.mulf %203, %205 : vector<16x32xf32>
      %cst_90 = arith.constant dense<0.000000e+00> : vector<16xf32>
      %207 = vector.multi_reduction <add>, %206, %cst_90 [1] : vector<16x32xf32> to vector<16xf32>
      %208 = vector.shape_cast %207 : vector<16xf32> to vector<16x1xf32>
      %cst_91 = arith.constant 3.200000e+01 : f32
      %209 = vector.broadcast %cst_91 : f32 to vector<16x1xf32>
      %210 = arith.divf %208, %209 : vector<16x1xf32>
      %211 = vector.broadcast %201 : vector<16x1xf32> to vector<16x32xf32>
      %212 = arith.subf %195, %211 : vector<16x32xf32>
      %cst_92 = arith.constant 9.99999996E-13 : f32
      %213 = vector.broadcast %cst_92 : f32 to vector<16x1xf32>
      %214 = arith.addf %210, %213 : vector<16x1xf32>
      %215 = math.rsqrt %214 : vector<16x1xf32>
      %216 = vector.broadcast %215 : vector<16x1xf32> to vector<16x32xf32>
      %217 = arith.mulf %212, %216 : vector<16x32xf32>
      %218 = vector.broadcast %196 : vector<1x32xf32> to vector<16x32xf32>
      %219 = arith.mulf %217, %218 : vector<16x32xf32>
      %220 = vector.broadcast %197 : vector<1x32xf32> to vector<16x32xf32>
      %221 = arith.addf %219, %220 : vector<16x32xf32>
      %c0_93 = arith.constant 0 : index
      %c0_94 = arith.constant 0 : index
      %222 = vector.load %arg20[%c0_93, %c0_94] : memref<16x32xf32, #tpu.memory_space<vmem>>, vector<16x32xf32>
      tpu.vector_store %arg20[%c0_93, %c0_94], %221 {strides = array<i32>} : memref<16x32xf32, #tpu.memory_space<vmem>>, vector<16x32xf32>,
    } else {
    }
    %c0 = arith.constant 0 : index
    %c0_1 = arith.constant 0 : index
    %3 = vector.load %arg20[%c0, %c0_1] : memref<16x32xf32, #tpu.memory_space<vmem>>, vector<16x32xf32>
    %4 = arith.truncf %3 : vector<16x32xf32> to vector<16x32xbf16>
    %c0_2 = arith.constant 0 : index
    %c0_3 = arith.constant 0 : index
    %c0_4 = arith.constant 0 : index
    %5 = vector.load %arg5[%c0_2, %c0_3, %c0_4] : memref<1x32x96xbf16, #tpu.memory_space<vmem>>, vector<1x32x96xbf16>
    %6 = vector.shape_cast %5 : vector<1x32x96xbf16> to vector<32x96xbf16>
    %cst = arith.constant dense<0.000000e+00> : vector<16x96xf32>
    %7 = tpu.matmul %4, %6, %cst {dimension_numbers = #tpu.dot_dimension_numbers<[1], [0], [0], [1], [0, 0, 1, 1], [], []>} : vector<16x32xbf16>, vector<32x96xbf16>, vector<16x96xf32> -> vector<16x96xf32>
    %c0_5 = arith.constant 0 : index
    %c0_6 = arith.constant 0 : index
    %c0_7 = arith.constant 0 : index
    %8 = vector.load %arg6[%c0_5, %c0_6, %c0_7] : memref<1x1x96xf32, #tpu.memory_space<vmem>>, vector<1x1x96xf32>
    %9 = vector.shape_cast %8 : vector<1x1x96xf32> to vector<1x96xf32>
    %10 = vector.broadcast %9 : vector<1x96xf32> to vector<16x96xf32>
    %11 = arith.addf %7, %10 : vector<16x96xf32>
    %12 = arith.truncf %11 : vector<16x96xf32> to vector<16x96xbf16>
    %c0_8 = arith.constant 0 : index
    %c0_9 = arith.constant 0 : index
    %13 = vector.load %arg2[%c0_8, %c0_9] : memref<2x8xf32, #tpu.memory_space<vmem>>, vector<2x8xf32>
    %14 = vector.extract_strided_slice %13 {offsets = [0, 0], sizes = [1, 8], strides = [1, 1]} : vector<2x8xf32> to vector<1x8xf32>
    %15 = vector.extract_strided_slice %12 {offsets = [0, 0], sizes = [8, 16], strides = [1, 1]} : vector<16x96xbf16> to vector<8x16xbf16>
    %16 = vector.extract_strided_slice %12 {offsets = [0, 32], sizes = [8, 16], strides = [1, 1]} : vector<16x96xbf16> to vector<8x16xbf16>
    %17 = vector.extract_strided_slice %12 {offsets = [0, 64], sizes = [8, 16], strides = [1, 1]} : vector<16x96xbf16> to vector<8x16xbf16>
    %cst_10 = arith.constant dense<0.000000e+00> : vector<8x8xf32>
    %18 = tpu.matmul %15, %16, %cst_10 {dimension_numbers = #tpu.dot_dimension_numbers<[1], [1], [0], [0], [0, 0, 1, 0], [], []>} : vector<8x16xbf16>, vector<8x16xbf16>, vector<8x8xf32> -> vector<8x8xf32>
    %cst_11 = arith.constant 2.500000e-01 : f32
    %19 = vector.broadcast %cst_11 : f32 to vector<8x8xf32>
    %20 = arith.mulf %18, %19 : vector<8x8xf32>
    %21 = vector.broadcast %14 : vector<1x8xf32> to vector<8x8xf32>
    %22 = arith.addf %20, %21 : vector<8x8xf32>
    %cst_12 = arith.constant dense<0xFF800000> : vector<8xf32>
    %23 = vector.multi_reduction <maximumf>, %22, %cst_12 [1] : vector<8x8xf32> to vector<8xf32>
    %24 = vector.shape_cast %23 : vector<8xf32> to vector<8x1xf32>
    %25 = vector.broadcast %24 : vector<8x1xf32> to vector<8x8xf32>
    %26 = arith.subf %22, %25 : vector<8x8xf32>
    %27 = math.exp %26 : vector<8x8xf32>
    %cst_13 = arith.constant dense<0.000000e+00> : vector<8xf32>
    %28 = vector.multi_reduction <add>, %27, %cst_13 [1] : vector<8x8xf32> to vector<8xf32>
    %29 = vector.shape_cast %28 : vector<8xf32> to vector<8x1xf32>
    %30 = tpu.reciprocal %29 {approx = true} : vector<8x1xf32> -> vector<8x1xf32>
    %31 = arith.truncf %27 : vector<8x8xf32> to vector<8x8xbf16>
    %cst_14 = arith.constant dense<0.000000e+00> : vector<8x16xf32>
    %32 = tpu.matmul %31, %17, %cst_14 {dimension_numbers = #tpu.dot_dimension_numbers<[1], [0], [0], [1], [0, 0, 1, 1], [], []>} : vector<8x8xbf16>, vector<8x16xbf16>, vector<8x16xf32> -> vector<8x16xf32>
    %33 = vector.broadcast %30 : vector<8x1xf32> to vector<8x16xf32>
    %34 = arith.mulf %32, %33 : vector<8x16xf32>
    %35 = vector.extract_strided_slice %12 {offsets = [0, 16], sizes = [8, 16], strides = [1, 1]} : vector<16x96xbf16> to vector<8x16xbf16>
    %36 = vector.extract_strided_slice %12 {offsets = [0, 48], sizes = [8, 16], strides = [1, 1]} : vector<16x96xbf16> to vector<8x16xbf16>
    %37 = vector.extract_strided_slice %12 {offsets = [0, 80], sizes = [8, 16], strides = [1, 1]} : vector<16x96xbf16> to vector<8x16xbf16>
    %cst_15 = arith.constant dense<0.000000e+00> : vector<8x8xf32>
    %38 = tpu.matmul %35, %36, %cst_15 {dimension_numbers = #tpu.dot_dimension_numbers<[1], [1], [0], [0], [0, 0, 1, 0], [], []>} : vector<8x16xbf16>, vector<8x16xbf16>, vector<8x8xf32> -> vector<8x8xf32>
    %cst_16 = arith.constant 2.500000e-01 : f32
    %39 = vector.broadcast %cst_16 : f32 to vector<8x8xf32>
    %40 = arith.mulf %38, %39 : vector<8x8xf32>
    %41 = vector.broadcast %14 : vector<1x8xf32> to vector<8x8xf32>
    %42 = arith.addf %40, %41 : vector<8x8xf32>
    %cst_17 = arith.constant dense<0xFF800000> : vector<8xf32>
    %43 = vector.multi_reduction <maximumf>, %42, %cst_17 [1] : vector<8x8xf32> to vector<8xf32>
    %44 = vector.shape_cast %43 : vector<8xf32> to vector<8x1xf32>
    %45 = vector.broadcast %44 : vector<8x1xf32> to vector<8x8xf32>
    %46 = arith.subf %42, %45 : vector<8x8xf32>
    %47 = math.exp %46 : vector<8x8xf32>
    %cst_18 = arith.constant dense<0.000000e+00> : vector<8xf32>
    %48 = vector.multi_reduction <add>, %47, %cst_18 [1] : vector<8x8xf32> to vector<8xf32>
    %49 = vector.shape_cast %48 : vector<8xf32> to vector<8x1xf32>
    %50 = tpu.reciprocal %49 {approx = true} : vector<8x1xf32> -> vector<8x1xf32>
    %51 = arith.truncf %47 : vector<8x8xf32> to vector<8x8xbf16>
    %cst_19 = arith.constant dense<0.000000e+00> : vector<8x16xf32>
    %52 = tpu.matmul %51, %37, %cst_19 {dimension_numbers = #tpu.dot_dimension_numbers<[1], [0], [0], [1], [0, 0, 1, 1], [], []>} : vector<8x8xbf16>, vector<8x16xbf16>, vector<8x16xf32> -> vector<8x16xf32>
    %53 = vector.broadcast %50 : vector<8x1xf32> to vector<8x16xf32>
    %54 = arith.mulf %52, %53 : vector<8x16xf32>
    %55 = tpu.concatenate %34, %54 in 1 : vector<8x16xf32>, vector<8x16xf32> -> vector<8x32xf32>
    %56 = vector.extract_strided_slice %13 {offsets = [1, 0], sizes = [1, 8], strides = [1, 1]} : vector<2x8xf32> to vector<1x8xf32>
    %57 = vector.extract_strided_slice %12 {offsets = [8, 0], sizes = [8, 16], strides = [1, 1]} : vector<16x96xbf16> to vector<8x16xbf16>
    %58 = vector.extract_strided_slice %12 {offsets = [8, 32], sizes = [8, 16], strides = [1, 1]} : vector<16x96xbf16> to vector<8x16xbf16>
    %59 = vector.extract_strided_slice %12 {offsets = [8, 64], sizes = [8, 16], strides = [1, 1]} : vector<16x96xbf16> to vector<8x16xbf16>
    %cst_20 = arith.constant dense<0.000000e+00> : vector<8x8xf32>
    %60 = tpu.matmul %57, %58, %cst_20 {dimension_numbers = #tpu.dot_dimension_numbers<[1], [1], [0], [0], [0, 0, 1, 0], [], []>} : vector<8x16xbf16>, vector<8x16xbf16>, vector<8x8xf32> -> vector<8x8xf32>
    %cst_21 = arith.constant 2.500000e-01 : f32
    %61 = vector.broadcast %cst_21 : f32 to vector<8x8xf32>
    %62 = arith.mulf %60, %61 : vector<8x8xf32>
    %63 = vector.broadcast %56 : vector<1x8xf32> to vector<8x8xf32>
    %64 = arith.addf %62, %63 : vector<8x8xf32>
    %cst_22 = arith.constant dense<0xFF800000> : vector<8xf32>
    %65 = vector.multi_reduction <maximumf>, %64, %cst_22 [1] : vector<8x8xf32> to vector<8xf32>
    %66 = vector.shape_cast %65 : vector<8xf32> to vector<8x1xf32>
    %67 = vector.broadcast %66 : vector<8x1xf32> to vector<8x8xf32>
    %68 = arith.subf %64, %67 : vector<8x8xf32>
    %69 = math.exp %68 : vector<8x8xf32>
    %cst_23 = arith.constant dense<0.000000e+00> : vector<8xf32>
    %70 = vector.multi_reduction <add>, %69, %cst_23 [1] : vector<8x8xf32> to vector<8xf32>
    %71 = vector.shape_cast %70 : vector<8xf32> to vector<8x1xf32>
    %72 = tpu.reciprocal %71 {approx = true} : vector<8x1xf32> -> vector<8x1xf32>
    %73 = arith.truncf %69 : vector<8x8xf32> to vector<8x8xbf16>
    %cst_24 = arith.constant dense<0.000000e+00> : vector<8x16xf32>
    %74 = tpu.matmul %73, %59, %cst_24 {dimension_numbers = #tpu.dot_dimension_numbers<[1], [0], [0], [1], [0, 0, 1, 1], [], []>} : vector<8x8xbf16>, vector<8x16xbf16>, vector<8x16xf32> -> vector<8x16xf32>
    %75 = vector.broadcast %72 : vector<8x1xf32> to vector<8x16xf32>
    %76 = arith.mulf %74, %75 : vector<8x16xf32>
    %77 = vector.extract_strided_slice %12 {offsets = [8, 16], sizes = [8, 16], strides = [1, 1]} : vector<16x96xbf16> to vector<8x16xbf16>
    %78 = vector.extract_strided_slice %12 {offsets = [8, 48], sizes = [8, 16], strides = [1, 1]} : vector<16x96xbf16> to vector<8x16xbf16>
    %79 = vector.extract_strided_slice %12 {offsets = [8, 80], sizes = [8, 16], strides = [1, 1]} : vector<16x96xbf16> to vector<8x16xbf16>
    %cst_25 = arith.constant dense<0.000000e+00> : vector<8x8xf32>
    %80 = tpu.matmul %77, %78, %cst_25 {dimension_numbers = #tpu.dot_dimension_numbers<[1], [1], [0], [0], [0, 0, 1, 0], [], []>} : vector<8x16xbf16>, vector<8x16xbf16>, vector<8x8xf32> -> vector<8x8xf32>
    %cst_26 = arith.constant 2.500000e-01 : f32
    %81 = vector.broadcast %cst_26 : f32 to vector<8x8xf32>
    %82 = arith.mulf %80, %81 : vector<8x8xf32>
    %83 = vector.broadcast %56 : vector<1x8xf32> to vector<8x8xf32>
    %84 = arith.addf %82, %83 : vector<8x8xf32>
    %cst_27 = arith.constant dense<0xFF800000> : vector<8xf32>
    %85 = vector.multi_reduction <maximumf>, %84, %cst_27 [1] : vector<8x8xf32> to vector<8xf32>
    %86 = vector.shape_cast %85 : vector<8xf32> to vector<8x1xf32>
    %87 = vector.broadcast %86 : vector<8x1xf32> to vector<8x8xf32>
    %88 = arith.subf %84, %87 : vector<8x8xf32>
    %89 = math.exp %88 : vector<8x8xf32>
    %cst_28 = arith.constant dense<0.000000e+00> : vector<8xf32>
    %90 = vector.multi_reduction <add>, %89, %cst_28 [1] : vector<8x8xf32> to vector<8xf32>
    %91 = vector.shape_cast %90 : vector<8xf32> to vector<8x1xf32>
    %92 = tpu.reciprocal %91 {approx = true} : vector<8x1xf32> -> vector<8x1xf32>
    %93 = arith.truncf %89 : vector<8x8xf32> to vector<8x8xbf16>
    %cst_29 = arith.constant dense<0.000000e+00> : vector<8x16xf32>
    %94 = tpu.matmul %93, %79, %cst_29 {dimension_numbers = #tpu.dot_dimension_numbers<[1], [0], [0], [1], [0, 0, 1, 1], [], []>} : vector<8x8xbf16>, vector<8x16xbf16>, vector<8x16xf32> -> vector<8x16xf32>
    %95 = vector.broadcast %92 : vector<8x1xf32> to vector<8x16xf32>
    %96 = arith.mulf %94, %95 : vector<8x16xf32>
    %97 = tpu.concatenate %76, %96 in 1 : vector<8x16xf32>, vector<8x16xf32> -> vector<8x32xf32>
    %98 = tpu.concatenate %55, %97 in 0 : vector<8x32xf32>, vector<8x32xf32> -> vector<16x32xf32>
    %99 = arith.truncf %98 : vector<16x32xf32> to vector<16x32xbf16>
    %c0_30 = arith.constant 0 : index
    %c0_31 = arith.constant 0 : index
    %c0_32 = arith.constant 0 : index
    %100 = vector.load %arg7[%c0_30, %c0_31, %c0_32] : memref<1x32x32xbf16, #tpu.memory_space<vmem>>, vector<1x32x32xbf16>
    %101 = vector.shape_cast %100 : vector<1x32x32xbf16> to vector<32x32xbf16>
    %cst_33 = arith.constant dense<0.000000e+00> : vector<16x32xf32>
    %102 = tpu.matmul %99, %101, %cst_33 {dimension_numbers = #tpu.dot_dimension_numbers<[1], [0], [0], [1], [0, 0, 1, 1], [], []>} : vector<16x32xbf16>, vector<32x32xbf16>, vector<16x32xf32> -> vector<16x32xf32>
    %c0_34 = arith.constant 0 : index
    %c0_35 = arith.constant 0 : index
    %c0_36 = arith.constant 0 : index
    %103 = vector.load %arg8[%c0_34, %c0_35, %c0_36] : memref<1x1x32xf32, #tpu.memory_space<vmem>>, vector<1x1x32xf32>
    %104 = vector.shape_cast %103 : vector<1x1x32xf32> to vector<1x32xf32>
    %105 = vector.broadcast %104 : vector<1x32xf32> to vector<16x32xf32>
    %106 = arith.addf %102, %105 : vector<16x32xf32>
    %107 = arith.addf %106, %3 : vector<16x32xf32>
    %c0_37 = arith.constant 0 : index
    %c0_38 = arith.constant 0 : index
    %c0_39 = arith.constant 0 : index
    %108 = vector.load %arg9[%c0_37, %c0_38, %c0_39] : memref<1x1x32xf32, #tpu.memory_space<vmem>>, vector<1x1x32xf32>
    %109 = vector.shape_cast %108 : vector<1x1x32xf32> to vector<1x32xf32>
    %c0_40 = arith.constant 0 : index
    %c0_41 = arith.constant 0 : index
    %c0_42 = arith.constant 0 : index
    %110 = vector.load %arg10[%c0_40, %c0_41, %c0_42] : memref<1x1x32xf32, #tpu.memory_space<vmem>>, vector<1x1x32xf32>
    %111 = vector.shape_cast %110 : vector<1x1x32xf32> to vector<1x32xf32>
    %cst_43 = arith.constant dense<0.000000e+00> : vector<16xf32>
    %112 = vector.multi_reduction <add>, %107, %cst_43 [1] : vector<16x32xf32> to vector<16xf32>
    %113 = vector.shape_cast %112 : vector<16xf32> to vector<16x1xf32>
    %cst_44 = arith.constant 3.200000e+01 : f32
    %114 = vector.broadcast %cst_44 : f32 to vector<16x1xf32>
    %115 = arith.divf %113, %114 : vector<16x1xf32>
    %116 = vector.broadcast %115 : vector<16x1xf32> to vector<16x32xf32>
    %117 = arith.subf %107, %116 : vector<16x32xf32>
    %118 = vector.broadcast %115 : vector<16x1xf32> to vector<16x32xf32>
    %119 = arith.subf %107, %118 : vector<16x32xf32>
    %120 = arith.mulf %117, %119 : vector<16x32xf32>
    %cst_45 = arith.constant dense<0.000000e+00> : vector<16xf32>
    %121 = vector.multi_reduction <add>, %120, %cst_45 [1] : vector<16x32xf32> to vector<16xf32>
    %122 = vector.shape_cast %121 : vector<16xf32> to vector<16x1xf32>
    %cst_46 = arith.constant 3.200000e+01 : f32
    %123 = vector.broadcast %cst_46 : f32 to vector<16x1xf32>
    %124 = arith.divf %122, %123 : vector<16x1xf32>
    %125 = vector.broadcast %115 : vector<16x1xf32> to vector<16x32xf32>
    %126 = arith.subf %107, %125 : vector<16x32xf32>
    %cst_47 = arith.constant 9.99999996E-13 : f32
    %127 = vector.broadcast %cst_47 : f32 to vector<16x1xf32>
    %128 = arith.addf %124, %127 : vector<16x1xf32>
    %129 = math.rsqrt %128 : vector<16x1xf32>
    %130 = vector.broadcast %129 : vector<16x1xf32> to vector<16x32xf32>
    %131 = arith.mulf %126, %130 : vector<16x32xf32>
    %132 = vector.broadcast %109 : vector<1x32xf32> to vector<16x32xf32>
    %133 = arith.mulf %131, %132 : vector<16x32xf32>
    %134 = vector.broadcast %111 : vector<1x32xf32> to vector<16x32xf32>
    %135 = arith.addf %133, %134 : vector<16x32xf32>
    %136 = arith.truncf %135 : vector<16x32xf32> to vector<16x32xbf16>
    %c0_48 = arith.constant 0 : index
    %c0_49 = arith.constant 0 : index
    %c0_50 = arith.constant 0 : index
    %137 = vector.load %arg11[%c0_48, %c0_49, %c0_50] : memref<1x32x64xbf16, #tpu.memory_space<vmem>>, vector<1x32x64xbf16>
    %138 = vector.shape_cast %137 : vector<1x32x64xbf16> to vector<32x64xbf16>
    %cst_51 = arith.constant dense<0.000000e+00> : vector<16x64xf32>
    %139 = tpu.matmul %136, %138, %cst_51 {dimension_numbers = #tpu.dot_dimension_numbers<[1], [0], [0], [1], [0, 0, 1, 1], [], []>} : vector<16x32xbf16>, vector<32x64xbf16>, vector<16x64xf32> -> vector<16x64xf32>
    %c0_52 = arith.constant 0 : index
    %c0_53 = arith.constant 0 : index
    %c0_54 = arith.constant 0 : index
    %140 = vector.load %arg12[%c0_52, %c0_53, %c0_54] : memref<1x1x64xf32, #tpu.memory_space<vmem>>, vector<1x1x64xf32>
    %141 = vector.shape_cast %140 : vector<1x1x64xf32> to vector<1x64xf32>
    %142 = vector.broadcast %141 : vector<1x64xf32> to vector<16x64xf32>
    %143 = arith.addf %139, %142 : vector<16x64xf32>
    %cst_55 = arith.constant 5.000000e-01 : f32
    %144 = vector.broadcast %cst_55 : f32 to vector<16x64xf32>
    %145 = arith.mulf %144, %143 : vector<16x64xf32>
    %cst_56 = arith.constant 0.707106769 : f32
    %146 = vector.broadcast %cst_56 : f32 to vector<16x64xf32>
    %147 = arith.mulf %143, %146 : vector<16x64xf32>
    %148 = math.erf %147 : vector<16x64xf32>
    %cst_57 = arith.constant 1.000000e+00 : f32
    %149 = vector.broadcast %cst_57 : f32 to vector<16x64xf32>
    %150 = arith.addf %149, %148 : vector<16x64xf32>
    %151 = arith.mulf %145, %150 : vector<16x64xf32>
    %152 = arith.truncf %151 : vector<16x64xf32> to vector<16x64xbf16>
    %c0_58 = arith.constant 0 : index
    %c0_59 = arith.constant 0 : index
    %c0_60 = arith.constant 0 : index
    %153 = vector.load %arg13[%c0_58, %c0_59, %c0_60] : memref<1x64x32xbf16, #tpu.memory_space<vmem>>, vector<1x64x32xbf16>
    %154 = vector.shape_cast %153 : vector<1x64x32xbf16> to vector<64x32xbf16>
    %cst_61 = arith.constant dense<0.000000e+00> : vector<16x32xf32>
    %155 = tpu.matmul %152, %154, %cst_61 {dimension_numbers = #tpu.dot_dimension_numbers<[1], [0], [0], [1], [0, 0, 1, 1], [], []>} : vector<16x64xbf16>, vector<64x32xbf16>, vector<16x32xf32> -> vector<16x32xf32>
    %c0_62 = arith.constant 0 : index
    %c0_63 = arith.constant 0 : index
    %c0_64 = arith.constant 0 : index
    %156 = vector.load %arg14[%c0_62, %c0_63, %c0_64] : memref<1x1x32xf32, #tpu.memory_space<vmem>>, vector<1x1x32xf32>
    %157 = vector.shape_cast %156 : vector<1x1x32xf32> to vector<1x32xf32>
    %158 = vector.broadcast %157 : vector<1x32xf32> to vector<16x32xf32>
    %159 = arith.addf %155, %158 : vector<16x32xf32>
    %160 = arith.addf %159, %135 : vector<16x32xf32>
    %c0_65 = arith.constant 0 : index
    %c0_66 = arith.constant 0 : index
    %c0_67 = arith.constant 0 : index
    %161 = vector.load %arg15[%c0_65, %c0_66, %c0_67] : memref<1x1x32xf32, #tpu.memory_space<vmem>>, vector<1x1x32xf32>
    %162 = vector.shape_cast %161 : vector<1x1x32xf32> to vector<1x32xf32>
    %c0_68 = arith.constant 0 : index
    %c0_69 = arith.constant 0 : index
    %c0_70 = arith.constant 0 : index
    %163 = vector.load %arg16[%c0_68, %c0_69, %c0_70] : memref<1x1x32xf32, #tpu.memory_space<vmem>>, vector<1x1x32xf32>
    %164 = vector.shape_cast %163 : vector<1x1x32xf32> to vector<1x32xf32>
    %cst_71 = arith.constant dense<0.000000e+00> : vector<16xf32>
    %165 = vector.multi_reduction <add>, %160, %cst_71 [1] : vector<16x32xf32> to vector<16xf32>
    %166 = vector.shape_cast %165 : vector<16xf32> to vector<16x1xf32>
    %cst_72 = arith.constant 3.200000e+01 : f32
    %167 = vector.broadcast %cst_72 : f32 to vector<16x1xf32>
    %168 = arith.divf %166, %167 : vector<16x1xf32>
    %169 = vector.broadcast %168 : vector<16x1xf32> to vector<16x32xf32>
    %170 = arith.subf %160, %169 : vector<16x32xf32>
    %171 = vector.broadcast %168 : vector<16x1xf32> to vector<16x32xf32>
    %172 = arith.subf %160, %171 : vector<16x32xf32>
    %173 = arith.mulf %170, %172 : vector<16x32xf32>
    %cst_73 = arith.constant dense<0.000000e+00> : vector<16xf32>
    %174 = vector.multi_reduction <add>, %173, %cst_73 [1] : vector<16x32xf32> to vector<16xf32>
    %175 = vector.shape_cast %174 : vector<16xf32> to vector<16x1xf32>
    %cst_74 = arith.constant 3.200000e+01 : f32
    %176 = vector.broadcast %cst_74 : f32 to vector<16x1xf32>
    %177 = arith.divf %175, %176 : vector<16x1xf32>
    %178 = vector.broadcast %168 : vector<16x1xf32> to vector<16x32xf32>
    %179 = arith.subf %160, %178 : vector<16x32xf32>
    %cst_75 = arith.constant 9.99999996E-13 : f32
    %180 = vector.broadcast %cst_75 : f32 to vector<16x1xf32>
    %181 = arith.addf %177, %180 : vector<16x1xf32>
    %182 = math.rsqrt %181 : vector<16x1xf32>
    %183 = vector.broadcast %182 : vector<16x1xf32> to vector<16x32xf32>
    %184 = arith.mulf %179, %183 : vector<16x32xf32>
    %185 = vector.broadcast %162 : vector<1x32xf32> to vector<16x32xf32>
    %186 = arith.mulf %184, %185 : vector<16x32xf32>
    %187 = vector.broadcast %164 : vector<1x32xf32> to vector<16x32xf32>
    %188 = arith.addf %186, %187 : vector<16x32xf32>
    %c0_76 = arith.constant 0 : index
    %c0_77 = arith.constant 0 : index
    %189 = vector.load %arg20[%c0_76, %c0_77] : memref<16x32xf32, #tpu.memory_space<vmem>>, vector<16x32xf32>
    tpu.vector_store %arg20[%c0_76, %c0_77], %188 {strides = array<i32>} : memref<16x32xf32, #tpu.memory_space<vmem>>, vector<16x32xf32>,
    %c1_i32 = arith.constant 1 : i32
    %190 = arith.cmpi eq, %arg0, %c1_i32 : i32
    %191 = arith.extui %190 : i1 to i32
    %c0_i32_78 = arith.constant 0 : i32
    %192 = arith.cmpi ne, %191, %c0_i32_78 : i32
    scf.if %192 {
      %193 = vector.extract_strided_slice %188 {offsets = [0, 0], sizes = [1, 32], strides = [1, 1]} : vector<16x32xf32> to vector<1x32xf32>
      %194 = vector.extract_strided_slice %188 {offsets = [8, 0], sizes = [1, 32], strides = [1, 1]} : vector<16x32xf32> to vector<1x32xf32>
      %195 = tpu.concatenate %193, %194 in 0 : vector<1x32xf32>, vector<1x32xf32> -> vector<2x32xf32>
      %c0_79 = arith.constant 0 : index
      %c0_80 = arith.constant 0 : index
      %196 = vector.load %arg17[%c0_79, %c0_80] : memref<32x4xf32, #tpu.memory_space<vmem>>, vector<32x4xf32>
      %cst_81 = arith.constant dense<0.000000e+00> : vector<2x4xf32>
      %197 = tpu.matmul %195, %196, %cst_81 {dimension_numbers = #tpu.dot_dimension_numbers<[1], [0], [0], [1], [0, 0, 1, 1], [], []>} : vector<2x32xf32>, vector<32x4xf32>, vector<2x4xf32> -> vector<2x4xf32>
      %c0_82 = arith.constant 0 : index
      %c0_83 = arith.constant 0 : index
      %198 = vector.load %arg18[%c0_82, %c0_83] : memref<1x4xf32, #tpu.memory_space<vmem>>, vector<1x4xf32>
      %199 = vector.broadcast %198 : vector<1x4xf32> to vector<2x4xf32>
      %200 = arith.addf %197, %199 : vector<2x4xf32>
      %cst_84 = arith.constant dense<0xFF800000> : vector<2xf32>
      %201 = vector.multi_reduction <maximumf>, %200, %cst_84 [1] : vector<2x4xf32> to vector<2xf32>
      %202 = vector.shape_cast %201 : vector<2xf32> to vector<2x1xf32>
      %203 = vector.broadcast %202 : vector<2x1xf32> to vector<2x4xf32>
      %204 = arith.subf %200, %203 : vector<2x4xf32>
      %205 = math.exp %204 : vector<2x4xf32>
      %cst_85 = arith.constant dense<0.000000e+00> : vector<2xf32>
      %206 = vector.multi_reduction <add>, %205, %cst_85 [1] : vector<2x4xf32> to vector<2xf32>
      %207 = vector.shape_cast %206 : vector<2xf32> to vector<2x1xf32>
      %208 = math.log %207 : vector<2x1xf32>
      %209 = vector.broadcast %208 : vector<2x1xf32> to vector<2x4xf32>
      %210 = arith.subf %204, %209 : vector<2x4xf32>
      %c0_86 = arith.constant 0 : index
      %c0_87 = arith.constant 0 : index
      %211 = vector.load %arg19[%c0_86, %c0_87] : memref<2x4xf32, #tpu.memory_space<vmem>>, vector<2x4xf32>
      tpu.vector_store %arg19[%c0_86, %c0_87], %210 {strides = array<i32>} : memref<2x4xf32, #tpu.memory_space<vmem>>, vector<2x4xf32>,
    } else {
    }
    return
  }
  func.func @transform_0(%arg0: i32) -> (i32, i32) {
    %c0_i32 = arith.constant 0 : i32
    %c0_i32_0 = arith.constant 0 : i32
    %c0_i32_1 = arith.constant 0 : i32
    return %c0_i32, %c0_i32_0 : i32, i32
  }
  func.func @transform_1(%arg0: i32) -> (i32, i32) {
    %c0_i32 = arith.constant 0 : i32
    %c0_i32_0 = arith.constant 0 : i32
    %c0_i32_1 = arith.constant 0 : i32
    return %c0_i32, %c0_i32_0 : i32, i32
  }
  func.func @transform_2(%arg0: i32) -> (i32, i32) {
    %c0_i32 = arith.constant 0 : i32
    %c0_i32_0 = arith.constant 0 : i32
    %c0_i32_1 = arith.constant 0 : i32
    return %c0_i32, %c0_i32_0 : i32, i32
  }
  func.func @transform_3(%arg0: i32) -> (i32, i32) {
    %c0_i32 = arith.constant 0 : i32
    %c0_i32_0 = arith.constant 0 : i32
    %c0_i32_1 = arith.constant 0 : i32
    return %c0_i32, %c0_i32_0 : i32, i32
  }
  func.func @transform_4(%arg0: i32) -> (i32, i32, i32) {
    %c0_i32 = arith.constant 0 : i32
    %c0_i32_0 = arith.constant 0 : i32
    %c0_i32_1 = arith.constant 0 : i32
    return %arg0, %c0_i32, %c0_i32_0 : i32, i32, i32
  }
  func.func @transform_5(%arg0: i32) -> (i32, i32, i32) {
    %c0_i32 = arith.constant 0 : i32
    %c0_i32_0 = arith.constant 0 : i32
    %c0_i32_1 = arith.constant 0 : i32
    return %arg0, %c0_i32, %c0_i32_0 : i32, i32, i32
  }
  func.func @transform_6(%arg0: i32) -> (i32, i32, i32) {
    %c0_i32 = arith.constant 0 : i32
    %c0_i32_0 = arith.constant 0 : i32
    %c0_i32_1 = arith.constant 0 : i32
    return %arg0, %c0_i32, %c0_i32_0 : i32, i32, i32
  }
  func.func @transform_7(%arg0: i32) -> (i32, i32, i32) {
    %c0_i32 = arith.constant 0 : i32
    %c0_i32_0 = arith.constant 0 : i32
    %c0_i32_1 = arith.constant 0 : i32
    return %arg0, %c0_i32, %c0_i32_0 : i32, i32, i32
  }
  func.func @transform_8(%arg0: i32) -> (i32, i32, i32) {
    %c0_i32 = arith.constant 0 : i32
    %c0_i32_0 = arith.constant 0 : i32
    %c0_i32_1 = arith.constant 0 : i32
    return %arg0, %c0_i32, %c0_i32_0 : i32, i32, i32
  }
  func.func @transform_9(%arg0: i32) -> (i32, i32, i32) {
    %c0_i32 = arith.constant 0 : i32
    %c0_i32_0 = arith.constant 0 : i32
    %c0_i32_1 = arith.constant 0 : i32
    return %arg0, %c0_i32, %c0_i32_0 : i32, i32, i32
  }
  func.func @transform_10(%arg0: i32) -> (i32, i32, i32) {
    %c0_i32 = arith.constant 0 : i32
    %c0_i32_0 = arith.constant 0 : i32
    %c0_i32_1 = arith.constant 0 : i32
    return %arg0, %c0_i32, %c0_i32_0 : i32, i32, i32
  }
  func.func @transform_11(%arg0: i32) -> (i32, i32, i32) {
    %c0_i32 = arith.constant 0 : i32
    %c0_i32_0 = arith.constant 0 : i32
    %c0_i32_1 = arith.constant 0 : i32
    return %arg0, %c0_i32, %c0_i32_0 : i32, i32, i32
  }
  func.func @transform_12(%arg0: i32) -> (i32, i32, i32) {
    %c0_i32 = arith.constant 0 : i32
    %c0_i32_0 = arith.constant 0 : i32
    %c0_i32_1 = arith.constant 0 : i32
    return %arg0, %c0_i32, %c0_i32_0 : i32, i32, i32
  }
  func.func @transform_13(%arg0: i32) -> (i32, i32, i32) {
    %c0_i32 = arith.constant 0 : i32
    %c0_i32_0 = arith.constant 0 : i32
    %c0_i32_1 = arith.constant 0 : i32
    return %arg0, %c0_i32, %c0_i32_0 : i32, i32, i32
  }
  func.func @transform_14(%arg0: i32) -> (i32, i32, i32) {
    %c0_i32 = arith.constant 0 : i32
    %c0_i32_0 = arith.constant 0 : i32
    %c0_i32_1 = arith.constant 0 : i32
    return %arg0, %c0_i32, %c0_i32_0 : i32, i32, i32
  }
  func.func @transform_15(%arg0: i32) -> (i32, i32, i32) {
    %c0_i32 = arith.constant 0 : i32
    %c0_i32_0 = arith.constant 0 : i32
    %c0_i32_1 = arith.constant 0 : i32
    return %arg0, %c0_i32, %c0_i32_0 : i32, i32, i32
  }
  func.func @transform_16(%arg0: i32) -> (i32, i32) {
    %c0_i32 = arith.constant 0 : i32
    %c0_i32_0 = arith.constant 0 : i32
    %c0_i32_1 = arith.constant 0 : i32
    return %c0_i32, %c0_i32_0 : i32, i32
  }
  func.func @transform_17(%arg0: i32) -> (i32, i32) {
    %c0_i32 = arith.constant 0 : i32
    %c0_i32_0 = arith.constant 0 : i32
    %c0_i32_1 = arith.constant 0 : i32
    return %c0_i32, %c0_i32_0 : i32, i32
  }
  func.func @transform_18(%arg0: i32) -> (i32, i32) {
    %c0_i32 = arith.constant 0 : i32
    %c0_i32_0 = arith.constant 0 : i32
    %c0_i32_1 = arith.constant 0 : i32
    return %c0_i32, %c0_i32_0 : i32, i32
  }
}

</mosaic_0001>

<bundles_post_ra>
// kernel: bert_classification_forward.1
= control target key start
LH: loop header
LB: loop body
LE: loop exit
PB: predicated region body
PF: predicated region fallthrough
CT: control target
= control target key end

     0   :  { %s2628_s0 = inlined_call_operand.vmem [shape: f32[16,32], index: 0, kind: input, shape index: {}]   ;;  %s2629_s1 = inlined_call_operand.vmem [shape: f32[2,8], index: 1, kind: input, shape index: {}]   ;;  %s2630_s2 = inlined_call_operand.vmem [shape: f32[1,32], index: 2, kind: input, shape index: {}]   ;;  %s2631_s3 = inlined_call_operand.vmem [shape: f32[1,32], index: 3, kind: input, shape index: {}]   ;;  %s2632_s4 = inlined_call_operand.vmem [shape: bf16[2,32,96], index: 4, kind: input, shape index: {}]   ;;  %s2633_s5 = inlined_call_operand.vmem [shape: f32[2,1,96], index: 5, kind: input, shape index: {}]   ;;  %s2634_s6 = inlined_call_operand.vmem [shape: bf16[2,32,32], index: 6, kind: input, shape index: {}]   ;;  %s2635_s7 = inlined_call_operand.vmem [shape: f32[2,1,32], index: 7, kind: input, shape index: {}]   ;;  %s2636_s8 = inlined_call_operand.vmem [shape: f32[2,1,32], index: 8, kind: input, shape index: {}]   ;;  %s2637_s9 = inlined_call_operand.vmem [shape: f32[2,1,32], index: 9, kind: input, shape index: {}]   ;;  %s2638_s10 = inlined_call_operand.vmem [shape: bf16[2,32,64], index: 10, kind: input, shape index: {}]   ;;  %s2639_s11 = inlined_call_operand.vmem [shape: f32[2,1,64], index: 11, kind: input, shape index: {}]   ;;  %s2640_s12 = inlined_call_operand.vmem [shape: bf16[2,64,32], index: 12, kind: input, shape index: {}]   ;;  %s2641_s13 = inlined_call_operand.vmem [shape: f32[2,1,32], index: 13, kind: input, shape index: {}]   ;;  %s2642_s14 = inlined_call_operand.vmem [shape: f32[2,1,32], index: 14, kind: input, shape index: {}]   ;;  %s2643_s15 = inlined_call_operand.vmem [shape: f32[2,1,32], index: 15, kind: input, shape index: {}]   ;;  %s2644_s16 = inlined_call_operand.vmem [shape: f32[32,4], index: 16, kind: input, shape index: {}]   ;;  %s2645_s17 = inlined_call_operand.vmem [shape: f32[1,4], index: 17, kind: input, shape index: {}]   ;;  %s2646_s18 = inlined_call_operand.hbm [shape: f32[2,4], index: 18, kind: output, shape index: {}]  }
   0x1   :  { %2652 = sst [smem:[#allocation8_spill]] %s2628_s0 }
   0x2   :  { %2653 = sst [smem:[#allocation9_spill]] %s2629_s1 }
   0x3   :  { %2654 = sst [smem:[#allocation10_spill]] %s2630_s2 }
   0x4   :  { %2655 = sst [smem:[#allocation11_spill]] %s2632_s4 }
   0x5   :  { %2656 = sst [smem:[#allocation12_spill]] %s2634_s6 }
   0x6   :  { %2657 = sst [smem:[#allocation13_spill]] %s2644_s16 }
   0x7   :  { %2658 = sst [smem:[#allocation14_spill]] %s2645_s17 }
   0x8   :  { %2659 = sst [smem:[#allocation15_spill]] %s2646_s18 }
   0x9   :  { %23 = vsyncpa [#allocation4], 0  ;;  %s2334_s27 = smov 0  }
   0xa LB: > { %2660 = sst [smem:[#allocation6_spill]] %s2224_s27  ;;  %s2340_s28 = sadd.s32 4294967295, %s2224_s27   ;;  %s2224_s27 = sphi %s2334_s27, %s29_s27  }
   0xb   : > { %p1921_p0 = scmp.ge.s32.totalorder %s2224_s27, 1  ;;  %p602_p1 = scmp.lt.s32.totalorder %s2224_s27, 3 }
   0xd   : > { %p603_p2 = pnand %p1921_p0, %p602_p1 }
   0xf   : > { %606 = sbr.rel (%p603_p2) target bundleno = 3311 (0xcef), region = 92 }
  0x16   : > { %p690_p3 = scmp.lt.s32.totalorder %s2340_s28, 1  ;;  %s2661_s4 = sld [smem:[#allocation11_spill]] }
  0x17   : > { %s2662_s6 = sld [smem:[#allocation12_spill]]  ;;  %p1930_p4 = scmp.ne.s32.totalorder %s2340_s28, 0 }
  0x18   : > { %s2346_s29 = scalar_select %p690_p3, %s2340_s28, 1 }
  0x19   : > { %738 = sbr.rel (%p1930_p4) target bundleno = 350 (0x15e), region = 96  ;;  %s2664_s25 = sld [smem:[#allocation8_spill]] (!%p1930_p4)  ;;  %vm745_vm0 = vcmask (!%p1930_p4), 261120   ;;  %vm739_vm1 = vcmask (!%p1930_p4), 25600   ;;  %v2226_v14 = vmov (!%p1930_p4), 0.0  }
  0x1a   : > { %s1970_s30 = sshll.u32 %s2346_s29, 4  ;;  %s727_s0 = scalar_lea.vmem %s2641_s13, %s2346_s29  ;;  %740 = vst.msk [vmem:[#allocation3] sm:$0x3] (!%p1930_p4), %vm739_vm1, %v2226_v14  ;;  %v1932_v24 = vld [vmem:[%s2631_s3] ss:$0 sm:$0xff] (!%p1930_p4) }
  0x1b   : > { %s730_s20 = scalar_lea.vmem %s2642_s14, %s2346_s29  ;;  %s733_s16 = scalar_lea.vmem %s2643_s15, %s2346_s29 }
  0x1c   : > { %s2356_s22 = scalar_lea.vmem %s2661_s4, %s1970_s30  ;;  %s2378_s4 = scalar_lea.vmem %s2638_s10, %s1970_s30 }
  0x1d   : > { %s2361_s24 = scalar_lea.vmem %s2662_s6, %s1970_s30  ;;  %s719_s6 = scalar_lea.vmem %s2639_s11, %s2346_s29 }
  0x1e   : > { %2663 = sst [smem:[#allocation7_spill]] %s2361_s24  ;;  %s1973_s24 = sshll.u32 %s2346_s29, 5 }
  0x1f   : > { %s2388_s27 = scalar_lea.vmem %s2640_s12, %s1973_s24  ;;  %v741_v0 = vld [vmem:[%s2664_s25] sm:$0xff] (!%p1930_p4)  ;;  %v742_v1 = vld [vmem:[%s2664_s25 + $0x8] sm:$0xff] (!%p1930_p4)  ;;  %s2665_s18 = sld [smem:[#allocation10_spill]] (!%p1930_p4) }
  0x20   : > { %v746_v2 = vsel %vm745_vm0, %v741_v0, 0.0  ;;  %v749_v3 = vsel %vm745_vm0, %v742_v1, 0.0 }
  0x21   : > { %747 = vadd.xlane.f32.xlu0 %v746_v2 }
  0x25   : > { %750 = vadd.xlane.f32.xlu0 %v749_v3  ;;  %v1931_v22 = vld [vmem:[%s2665_s18] ss:$0 sm:$0xff] }
  0xae   : > { %v748_v4 = vpop.xlane.xlu0 %747 }
  0xaf   : > { %v753_v5 = vmul.f32 0.03125, %v748_v4 }
  0xb1   : > { %v755_v6 = vsub.f32 %v741_v0, %v753_v5 }
  0xb2   : > { %v751_v7 = vpop.xlane.xlu0 %750 }
  0xb3   : > { %v754_v8 = vmul.f32 0.03125, %v751_v7  ;;  %v757_v9 = vmul.f32 %v755_v6, %v755_v6 }
  0xb5   : > { %v756_v10 = vsub.f32 %v742_v1, %v754_v8  ;;  %v759_v11 = vsel %vm745_vm0, %v757_v9, 0.0 }
  0xb6   : > { %760 = vadd.xlane.f32.xlu1 %v759_v11 }
  0xb7   : > { %v758_v12 = vmul.f32 %v756_v10, %v756_v10 }
  0xb9   : > { %v762_v13 = vsel %vm745_vm0, %v758_v12, 0.0 }
  0xba   : > { %763 = vadd.xlane.f32.xlu1 %v762_v13 }
 0x143   : > { %v761_v15 = vpop.xlane.xlu1 %760 }
 0x144   : > { %v765_v16 = vmul.f32 0.03125, %v761_v15 }
 0x146   : > { %v767_v17 = vadd.f32 1e-12, %v765_v16 }
 0x147   : > { %v764_v18 = vpop.xlane.xlu1 %763 }
 0x148   : > { %2137 = vrsqrt.f32 %v767_v17  ;;  %v766_v19 = vmul.f32 0.03125, %v764_v18 }
 0x14a   : > { %v768_v20 = vadd.f32 1e-12, %v766_v19 }
 0x14c   : > { %2139 = vrsqrt.f32 %v768_v20 }
 0x152   : > { %v2138_v21 = vpop.eup %2137 }
 0x153   : > { %v771_v23 = vmul.f32 %v2138_v21, %v755_v6 }
 0x155   : > { %v779_v25 = vmul.f32 %v1931_v22, %v771_v23 }
 0x156   : > { %v2140_v26 = vpop.eup %2139 }
 0x157   : > { %v787_v27 = vadd.f32 %v1932_v24, %v779_v25  ;;  %v772_v28 = vmul.f32 %v2140_v26, %v756_v10 }
 0x159   : > { %789 = vst.msk [vmem:[#allocation2] sm:$0xff] %vm745_vm0, %v787_v27  ;;  %v780_v29 = vmul.f32 %v1931_v22, %v772_v28 }
 0x15b   : > { %v788_v30 = vadd.f32 %v1932_v24, %v780_v29 }
 0x15d   : > { %790 = vst.msk [vmem:[#allocation2 + $0x8] sm:$0xff] %vm745_vm0, %v788_v30 }
 0x15e PF: > { %v2146_v31 = vld [vmem:[%s2356_s22] sm:$0xff]   ;;  %v2227_v32 = vmov 0.0   ;;  %v2147_v33 = vld [vmem:[%s2356_s22 + $0x8] sm:$0xff]   ;;  %vm2228_vm2 = vmmov 0   ;;  %vm817_vm3 = vcmask 261120   ;;  %s2666_s2 = scalar_lea.vmem %s2633_s5, %s2346_s29  ;;  %s2229_s23 = smov 112   ;;  %v915_v58 = vlaneseq }
 0x15f   : > { %2009 = vmatprep.subr.bf16.mxu0 %v2227_v32  ;;  %2017 = vmatprep.subr.bf16.mxu1 %v2227_v32  ;;  %v1933_v37 = vld [vmem:[%s2666_s2] ss:$0 sm:$0xff]  ;;  %s2230_s24 = smov 96   ;;  %s2231_s26 = smov 80   ;;  %vm867_vm4 = vcmask 130048   ;;  %vm937_vm5 = vcmask 1043456  }
 0x160   : > { %2010 = vmatpush3.bf16.msra.mxu0 %v2146_v31  ;;  %2013 = vmatprep.mubr.msk.bf16.mxu0 %vm2228_vm2, %v2227_v32  ;;  %v2427_v34 = vld [vmem:[#allocation2] sm:$0xff]  ;;  %s2232_s1 = smov 64   ;;  %v916_v59 = vshrl.u32 %v915_v58, 7  ;;  %s2667_s19 = sld [smem:[#allocation9_spill]]  ;;  %vm920_vm6 = vcmask 64512   ;;  %vm1564_vm7 = vcmask 523264  }
 0x161   : > { %2011 = vmatprep.subr.bf16.mxu0 %v2227_v32  ;;  %2019 = vmatprep.mubr.msk.bf16.mxu1 %vm2228_vm2, %v2227_v32  ;;  %s2233_s30 = smov 48   ;;  %s2668_s22 = sld [smem:[#allocation7_spill]] }
 0x162   : > { %v917_v60 = vsub.s32 0, %v916_v59  ;;  %v1151_v12 = vsub.s32 1, %v916_v59  ;;  %s2234_s21 = smov 16   ;;  %p1963_p5 = scmp.ne.s32.totalorder %s2340_s28, 1 }
 0x163   : > { %vm2236_vm8 = vmmov (!%p1963_p5), 0   ;;  %vm1664_vm9 = vcmask (!%p1963_p5), 1040384   ;;  %vm1750_vm10 = vcmask (!%p1963_p5), 25600  }
 0x164   : > { %v2429_v35 = vld [vmem:[#allocation2 + $0x8] sm:$0xff]  ;;  %2012 = vmatpush3.bf16.msra.mxu0 %v2147_v33 }
 0x165   : > { %v793_v36 = vpack.c.bf16 %v2429_v35, %v2427_v34  ;;  %2023 = vmatprep.subr.bf16.mxu0 %v2227_v32 }
 0x166   : > { %v863_v61 = vld [vmem:[%s2667_s19] sm:$0x3]  ;;  %s2671_s19 = scalar_lea.vmem %s2637_s9, %s2346_s29 }
 0x167   : > { %2014 = vmatmul.mubr.msk.bf16.vlgmr.msra.gmra.mrb[0].mxu0 %vm817_vm3, %v793_v36  ;;  %v918_v62 = vrot.slane %v863_v61, %v917_v60  ;;  %v1152_v14 = vrot.slane %v863_v61, %v1151_v12 }
 0x168   : > { %2025 = vmatprep.mubr.msk.bf16.mxu0 %vm2228_vm2, %v2227_v32 }
 0x23a   : > { %v855_v38 = vpop.f32.mrb[0].mxu0 }
 0x23b   : > { %v2015_v39 = vpop.f32.mrb[1].mxu0  ;;  %v856_v41 = vadd.f32 %v1933_v37, %v855_v38 }
 0x23c   : > { %v858_v40 = vpop.f32.mrb[2].mxu0 }
 0x23d   : > { %v859_v42 = vadd.f32 %v1933_v37, %v858_v40  ;;  %v2016_v43 = vpop.f32.mrb[3].mxu0 }
 0x23f   : > { %v2445_v44 = vpack.c.bf16 %v859_v42, %v856_v41 }
 0x241   : > { %982 = vrot.lane.b32.xlu1 %v2445_v44, %s2229_s23  ;;  %865 = vrot.lane.b32.xlu0 %v2445_v44, %s2230_s24  ;;  %v2450_v45 = vrot.slane %v2445_v44, 4 }
 0x245   : > { %984 = vrot.lane.b32.xlu0 %v2445_v44, %s2231_s26  ;;  %1100 = vrot.lane.b32.xlu1 %v2450_v45, %s2230_s24  ;;  %s2669_s24 = scalar_lea.vmem %s2635_s7, %s2346_s29 }
 0x249   : > { %1216 = vrot.lane.b32.xlu0 %v2450_v45, %s2231_s26  ;;  %1214 = vrot.lane.b32.xlu1 %v2450_v45, %s2229_s23  ;;  %s2672_s26 = sld [smem:[#allocation13_spill]] (!%p1963_p5) }
 0x24d   : > { %932 = vrot.lane.b32.xlu1 %v2445_v44, %s2232_s1 }
 0x2b3   : > { %v983_v46 = vpop.permute.xlu1 %982  ;;  %v866_v47 = vpop.permute.xlu0 %865 }
 0x2b4   : > { %v872_v48 = vsel %vm867_vm4, %v866_v47, 0 }
 0x2b5   : > { %2018 = vmatpush3.bf16.xpose.msra.mxu1 %v872_v48 }
 0x2b6   : > { %2029 = vmatprep.subr.bf16.mxu1 %v2227_v32 }
 0x2b7   : > { %v1101_v49 = vpop.permute.xlu1 %1100  ;;  %v985_v50 = vpop.permute.xlu0 %984 }
 0x2b8   : > { %v990_v52 = vsel %vm867_vm4, %v985_v50, 0  ;;  %v1106_v55 = vsel %vm867_vm4, %v1101_v49, 0 }
 0x2bb   : > { %v1215_v51 = vpop.permute.xlu1 %1214  ;;  %v1217_v56 = vpop.permute.xlu0 %1216 }
 0x2bc   : > { %2020 = vmatmul.mubr.msk.bf16.vlgmr.msra.gmra.mrb[0].mxu1 %vm867_vm4, %v2445_v44  ;;  %v1222_v57 = vsel %vm867_vm4, %v1217_v56, 0 }
 0x2bd   : > { %2030 = vmatpush3.bf16.xpose.msra.mxu1 %v990_v52  ;;  %2031 = vmatprep.mubr.msk.bf16.mxu1 %vm2228_vm2, %v2227_v32 }
 0x2be   : > { %2041 = vmatprep.subr.bf16.mxu1 %v2227_v32 }
 0x2bf   : > { %v933_v53 = vpop.permute.xlu1 %932 }
 0x2c0   : > { %v939_v54 = vsel %vm937_vm5, %v933_v53, 0 }
 0x2c1   : > { %2024 = vmatpush3.bf16.msra.mxu0 %v939_v54 }
 0x2c2   : > { %2035 = vmatprep.subr.bf16.mxu0 %v2227_v32 }
 0x2c4   : > { %2032 = vmatmul.mubr.msk.bf16.vlgmr.msra.gmra.mrb[4].mxu1 %vm867_vm4, %v983_v46 }
 0x2c5   : > { %2042 = vmatpush3.bf16.xpose.msra.mxu1 %v1106_v55  ;;  %2043 = vmatprep.mubr.msk.bf16.mxu1 %vm2228_vm2, %v2227_v32 }
 0x2c6   : > { %2053 = vmatprep.subr.bf16.mxu1 %v2227_v32 }
 0x2cc   : > { %2044 = vmatmul.mubr.msk.bf16.vlgmr.msra.gmra.mrb[8].mxu1 %vm867_vm4, %v2450_v45 }
 0x2cd   : > { %2054 = vmatpush3.bf16.xpose.msra.mxu1 %v1222_v57  ;;  %2055 = vmatprep.mubr.msk.bf16.mxu1 %vm2228_vm2, %v2227_v32 }
 0x2ce   : > { %2065 = vmatprep.subr.bf16.mxu1 %v2227_v32 }
 0x2d4   : > { %2056 = vmatmul.mubr.msk.bf16.vlgmr.msra.gmra.mrb[12].mxu1 %vm867_vm4, %v1215_v51 }
 0x2d5   : > { %2069 = vmatprep.mubr.msk.bf16.mxu1 %vm2228_vm2, %v2227_v32 }
 0x38f   : > { %v908_v63 = vpop.f32.mrb[0].mxu1 }
 0x390   : > { %v914_v0 = vmul.f32 0.25, %v908_v63  ;;  %v2021_v1 = vpop.f32.mrb[1].mxu1 }
 0x391   : > { %v911_v2 = vpop.f32.mrb[2].mxu1 }
 0x392   : > { %v2022_v3 = vpop.f32.mrb[3].mxu1  ;;  %v919_v4 = vadd.f32 %v918_v62, %v914_v0 }
 0x394   : > { %v921_v5 = vsel %vm920_vm6, %v919_v4, -inf }
 0x395   : > { %922 = vmax.xlane.f32.xlu0 %v921_v5 }
 0x397   : > { %v1026_v6 = vpop.f32.mrb[4].mxu1 }
 0x398   : > { %v1032_v7 = vmul.f32 0.25, %v1026_v6  ;;  %v2033_v8 = vpop.f32.mrb[5].mxu1 }
 0x399   : > { %v1029_v9 = vpop.f32.mrb[6].mxu1 }
 0x39a   : > { %v2034_v10 = vpop.f32.mrb[7].mxu1  ;;  %v1033_v11 = vadd.f32 %v1032_v7, %v918_v62  ;;  %v2148_v62 = vld [vmem:[%s2668_s22] sm:$0xff]  }
 0x39b   : > { %2066 = vmatpush3.bf16.msra.mxu1 %v2148_v62 }
 0x39c   : > { %v1034_v13 = vsel %vm920_vm6, %v1033_v11, -inf  ;;  %2067 = vmatprep.subr.bf16.mxu1 %v2227_v32 }
 0x39d   : > { %1035 = vmax.xlane.f32.xlu1 %v1034_v13 }
 0x39f   : > { %v1142_v15 = vpop.f32.mrb[8].mxu1 }
 0x3a0   : > { %v1148_v16 = vmul.f32 0.25, %v1142_v15  ;;  %v2045_v17 = vpop.f32.mrb[9].mxu1 }
 0x3a1   : > { %v1145_v18 = vpop.f32.mrb[10].mxu1 }
 0x3a2   : > { %v2046_v19 = vpop.f32.mrb[11].mxu1  ;;  %v1153_v20 = vadd.f32 %v1152_v14, %v1148_v16 }
 0x3a4   : > { %v1154_v21 = vsel %vm920_vm6, %v1153_v20, -inf }
 0x3a5   : > { %1155 = vmax.xlane.f32.xlu0 %v1154_v21 }
 0x3a7   : > { %v1258_v22 = vpop.f32.mrb[12].mxu1 }
 0x3a8   : > { %v1264_v23 = vmul.f32 0.25, %v1258_v22  ;;  %v2057_v24 = vpop.f32.mrb[13].mxu1 }
 0x3a9   : > { %v1261_v25 = vpop.f32.mrb[14].mxu1 }
 0x3aa   : > { %v2058_v26 = vpop.f32.mrb[15].mxu1  ;;  %v1265_v27 = vadd.f32 %v1264_v23, %v1152_v14 }
 0x3ac   : > { %v1266_v28 = vsel %vm920_vm6, %v1265_v27, -inf }
 0x3ad   : > { %1267 = vmax.xlane.f32.xlu0 %v1266_v28 }
 0x3ae   : > { %1165 = vrot.lane.b32.xlu1 %v2450_v45, %s2232_s1 }
 0x3b2   : > { %1277 = vrot.lane.b32.xlu1 %v2450_v45, %s2233_s30 }
 0x3c3   : > { %1045 = vrot.lane.b32.xlu0 %v2445_v44, %s2233_s30 }
 0x422   : > { %v923_v29 = vpop.xlane.xlu0 %922 }
 0x423   : > { %v924_v30 = vsub.f32 %v919_v4, %v923_v29 }
 0x425   : > { %v925_v31 = vmul.f32 1.442695, %v924_v30 }
 0x427   : > { %2156 = vpow2.f32 %v925_v31 }
 0x42a   : > { %v1036_v33 = vpop.xlane.xlu1 %1035 }
 0x42b   : > { %v1037_v36 = vsub.f32 %v1033_v11, %v1036_v33  ;;  %v2149_v11 = vld [vmem:[%s2668_s22 + $0x8] sm:$0xff]   ;;  %s2673_s22 = sld [smem:[#allocation14_spill]] (!%p1963_p5) }
 0x42c   : > { %2068 = vmatpush3.bf16.msra.mxu1 %v2149_v11 }
 0x42d   : > { %v1038_v37 = vmul.f32 1.442695, %v1037_v36  ;;  %2081 = vmatprep.subr.bf16.mxu1 %v2227_v32 }
 0x42e   : > { %v1166_v51 = vpop.permute.xlu1 %1165 }
 0x42f   : > { %2158 = vpow2.f32 %v1038_v37  ;;  %v1171_v55 = vsel %vm937_vm5, %v1166_v51, 0 }
 0x431   : > { %v2157_v38 = vpop.eup %2156 }
 0x432   : > { %v1156_v39 = vpop.xlane.xlu0 %1155  ;;  %v931_v40 = vpack.c.bf16 %v2157_v38, %v2157_v38  ;;  %v927_v49 = vsel %vm920_vm6, %v2157_v38, 0.0  ;;  %v1278_v56 = vpop.permute.xlu1 %1277  ;;  %v1945_v38 = vld [vmem:[%s2669_s24] ss:$0 sm:$0xff] }
 0x433   : > { %v1157_v41 = vsub.f32 %v1153_v20, %v1156_v39  ;;  %v1283_v60 = vsel %vm937_vm5, %v1278_v56, 0 }
 0x434   : > { %2026 = vmatmul.mubr.msk.bf16.vlgmr.msra.gmra.mrb[4].mxu0 %vm920_vm6, %v931_v40 }
 0x435   : > { %v1158_v42 = vmul.f32 1.442695, %v1157_v41  ;;  %2037 = vmatprep.mubr.msk.bf16.mxu0 %vm2228_vm2, %v2227_v32 }
 0x437   : > { %2160 = vpow2.f32 %v1158_v42 }
 0x439   : > { %v2159_v43 = vpop.eup %2158 }
 0x43a   : > { %v1268_v44 = vpop.xlane.xlu0 %1267  ;;  %v1040_v45 = vsel %vm920_vm6, %v2159_v43, 0.0  ;;  %v1044_v53 = vpack.c.bf16 %v2159_v43, %v2159_v43 }
 0x43b   : > { %v1269_v46 = vsub.f32 %v1265_v27, %v1268_v44  ;;  %1041 = vadd.xlane.f32.xlu0 %v1040_v45 }
 0x43d   : > { %v1270_v47 = vmul.f32 1.442695, %v1269_v46 }
 0x43e   : > { %v1046_v48 = vpop.permute.xlu0 %1045 }
 0x43f   : > { %2162 = vpow2.f32 %v1270_v47  ;;  %v1051_v50 = vsel %vm937_vm5, %v1046_v48, 0  ;;  %928 = vadd.xlane.f32.xlu0 %v927_v49 }
 0x440   : > { %2036 = vmatpush3.bf16.msra.mxu0 %v1051_v50 }
 0x441   : > { %v2161_v52 = vpop.eup %2160  ;;  %2047 = vmatprep.subr.bf16.mxu0 %v2227_v32 }
 0x442   : > { %v1160_v54 = vsel %vm920_vm6, %v2161_v52, 0.0  ;;  %v1164_v58 = vpack.c.bf16 %v2161_v52, %v2161_v52 }
 0x443   : > { %2038 = vmatmul.mubr.msk.bf16.vlgmr.msra.gmra.mrb[8].mxu0 %vm920_vm6, %v1044_v53  ;;  %1161 = vadd.xlane.f32.xlu0 %v1160_v54 }
 0x444   : > { %2048 = vmatpush3.bf16.msra.mxu0 %v1171_v55  ;;  %2049 = vmatprep.mubr.msk.bf16.mxu0 %vm2228_vm2, %v2227_v32 }
 0x445   : > { %2059 = vmatprep.subr.bf16.mxu0 %v2227_v32 }
 0x449   : > { %v2163_v57 = vpop.eup %2162 }
 0x44a   : > { %v1272_v59 = vsel %vm920_vm6, %v2163_v57, 0.0  ;;  %v1276_v61 = vpack.c.bf16 %v2163_v57, %v2163_v57 }
 0x44b   : > { %1273 = vadd.xlane.f32.xlu1 %v1272_v59  ;;  %2050 = vmatmul.mubr.msk.bf16.vlgmr.msra.gmra.mrb[12].mxu0 %vm920_vm6, %v1164_v58  ;;  %v2151_v58 = vld [vmem:[%s2378_s4 + $0x8] sm:$0xff]  }
 0x44c   : > { %2060 = vmatpush3.bf16.msra.mxu0 %v1283_v60  ;;  %2061 = vmatprep.mubr.msk.bf16.mxu0 %vm2228_vm2, %v2227_v32 }
 0x44d   : > { %2073 = vmatprep.subr.bf16.mxu0 %v2227_v32 }
 0x453   : > { %2062 = vmatmul.mubr.msk.bf16.vlgmr.msra.gmra.mrb[16].mxu0 %vm920_vm6, %v1276_v61 }
 0x454   : > { %2077 = vmatprep.mubr.msk.bf16.mxu0 %vm2228_vm2, %v2227_v32 }
 0x4c8   : > { %v1042_v5 = vpop.xlane.xlu0 %1041 }
 0x4c9   : > { %2164 = vrcp.f32 %v1042_v5 }
 0x4cc   : > { %v929_v23 = vpop.xlane.xlu0 %928 }
 0x4d0   : > { %v1162_v24 = vpop.xlane.xlu0 %1161 }
 0x4d3   : > { %v2165_v14 = vpop.eup %2164 }
 0x4d8   : > { %v1274_v7 = vpop.xlane.xlu1 %1273 }
 0x4d9   : > { %2166 = vrcp.f32 %v1274_v7  ;;  %v1950_v7 = vld [vmem:[%s2671_s19] ss:$0 sm:$0xff] }
 0x4da   : > { %2168 = vrcp.f32 %v929_v23 }
 0x4db   : > { %2170 = vrcp.f32 %v1162_v24 }
 0x4e3   : > { %v2167_v15 = vpop.eup %2166 }
 0x4e4   : > { %v2169_v25 = vpop.eup %2168 }
 0x4e5   : > { %v2171_v26 = vpop.eup %2170 }
 0x507   : > { %v975_v63 = vpop.f32.mrb[4].mxu0 }
 0x508   : > { %v2027_v0 = vpop.f32.mrb[5].mxu0  ;;  %v981_v28 = vmul.f32 %v2169_v25, %v975_v63 }
 0x509   : > { %v978_v1 = vpop.f32.mrb[6].mxu0 }
 0x50a   : > { %v2028_v2 = vpop.f32.mrb[7].mxu0 }
 0x516   : > { %v1087_v3 = vpop.f32.mrb[8].mxu0 }
 0x517   : > { %v2039_v4 = vpop.f32.mrb[9].mxu0  ;;  %v1093_v17 = vmul.f32 %v2165_v14, %v1087_v3  ;;  %v2154_v14 = vld [vmem:[%s2388_s27 + $0x10] sm:$0xff]  }
 0x518   : > { %v1090_v6 = vpop.f32.mrb[10].mxu0 }
 0x519   : > { %v2040_v8 = vpop.f32.mrb[11].mxu0 }
 0x51e   : > { %v1207_v9 = vpop.f32.mrb[12].mxu0 }
 0x51f   : > { %v2051_v10 = vpop.f32.mrb[13].mxu0  ;;  %v1213_v29 = vmul.f32 %v2171_v26, %v1207_v9 }
 0x520   : > { %v1210_v12 = vpop.f32.mrb[14].mxu0 }
 0x521   : > { %v2052_v13 = vpop.f32.mrb[15].mxu0  ;;  %v2152_v12 = vld [vmem:[%s2388_s27] sm:$0xff]  }
 0x522   : > { %v2153_v13 = vld [vmem:[%s2388_s27 + $0x8] sm:$0xff]  }
 0x526   : > { %v1319_v16 = vpop.f32.mrb[16].mxu0 }
 0x527   : > { %v1325_v18 = vmul.f32 %v2167_v15, %v1319_v16  ;;  %v2063_v19 = vpop.f32.mrb[17].mxu0  ;;  %v2155_v15 = vld [vmem:[%s2388_s27 + $0x18] sm:$0xff]   ;;  %v1951_v16 = vld [vmem:[%s719_s6] ss:$0 sm:$0xff] }
 0x528   : > { %v1322_v20 = vpop.f32.mrb[18].mxu0 }
 0x529   : > { %v2141_v21 = vpack.i.bf16 %v1325_v18, %v1093_v17  ;;  %v2064_v22 = vpop.f32.mrb[19].mxu0 }
 0x52b   : > { %2142 = vrot.lane.b32.xlu1 %v2141_v21, %s2234_s21 }
 0x59d   : > { %v2143_v27 = vpop.permute.xlu1 %2142 }
 0x59e   : > { %v2145_v30 = vunpack.i.h.bf16 %v2143_v27  ;;  %v2144_v31 = vunpack.i.l.bf16 %v2143_v27 }
 0x5a0   : > { %v1330_v33 = vsel %vm867_vm4, %v1213_v29, %v2145_v30  ;;  %v1098_v36 = vsel %vm867_vm4, %v981_v28, %v2144_v31 }
 0x5a1   : > { %v1331_v37 = vpack.c.bf16 %v1330_v33, %v1098_v36  ;;  %v1955_v36 = vld [vmem:[%s727_s0] ss:$0 sm:$0xff] }
 0x5a3   : > { %2070 = vmatmul.mubr.msk.bf16.vlgmr.msra.gmra.mrb[16].mxu1 %vm817_vm3, %v1331_v37 }
 0x5a4   : > { %2089 = vmatprep.mubr.msk.bf16.mxu1 %vm2228_vm2, %v2227_v32  ;;  %2082 = vmatpush3.bf16.msra.mxu1 %v2152_v12  ;;  %v1669_v12 = vld [vmem:[%s2672_s26 + $0x18] sm:$0xff] (!%p1963_p5) }
 0x5a5   : > { %2083 = vmatprep.subr.bf16.mxu1 %v2227_v32 }
 0x5a8   : > { %2084 = vmatpush3.bf16.msra.mxu1 %v2153_v13  ;;  %v2237_v13 = vmov (!%p1963_p5), 0.0  }
 0x5a9   : > { %2085 = vmatprep.subr.bf16.mxu1 %v2227_v32 }
 0x5ac   : > { %2086 = vmatpush3.bf16.msra.mxu1 %v2154_v14 }
 0x5ad   : > { %2087 = vmatprep.subr.bf16.mxu1 %v2227_v32 }
 0x5b0   : > { %2088 = vmatpush3.bf16.msra.mxu1 %v2155_v15 }
 0x676   : > { %v1392_v39 = vpop.f32.mrb[16].mxu1 }
 0x677   : > { %v1393_v40 = vadd.f32 %v1945_v38, %v1392_v39  ;;  %v2071_v41 = vpop.f32.mrb[17].mxu1 }
 0x678   : > { %v1395_v42 = vpop.f32.mrb[18].mxu1 }
 0x679   : > { %v1396_v43 = vadd.f32 %v1945_v38, %v1395_v42  ;;  %v2072_v44 = vpop.f32.mrb[19].mxu1  ;;  %v1399_v45 = vadd.f32 %v1393_v40, %v2427_v34 }
 0x67b   : > { %v1403_v46 = vsel %vm817_vm3, %v1399_v45, 0.0  ;;  %v1400_v47 = vadd.f32 %v1396_v43, %v2429_v35  ;;  %v2150_v35 = vld [vmem:[%s2378_s4] sm:$0xff]   ;;  %s2670_s4 = scalar_lea.vmem %s2636_s8, %s2346_s29 }
 0x67c   : > { %1404 = vadd.xlane.f32.xlu0 %v1403_v46  ;;  %2074 = vmatpush3.bf16.msra.mxu0 %v2150_v35  ;;  %v1949_v3 = vld [vmem:[%s2670_s4] ss:$0 sm:$0xff] }
 0x67d   : > { %v1406_v48 = vsel %vm817_vm3, %v1400_v47, 0.0  ;;  %2075 = vmatprep.subr.bf16.mxu0 %v2227_v32 }
 0x680   : > { %1407 = vadd.xlane.f32.xlu0 %v1406_v48  ;;  %2076 = vmatpush3.bf16.msra.mxu0 %v2151_v58 }
 0x709   : > { %v1405_v49 = vpop.xlane.xlu0 %1404 }
 0x70a   : > { %v1410_v50 = vmul.f32 0.03125, %v1405_v49 }
 0x70c   : > { %v1412_v51 = vsub.f32 %v1399_v45, %v1410_v50 }
 0x70d   : > { %v1408_v52 = vpop.xlane.xlu0 %1407 }
 0x70e   : > { %v1411_v53 = vmul.f32 0.03125, %v1408_v52  ;;  %v1414_v54 = vmul.f32 %v1412_v51, %v1412_v51 }
 0x710   : > { %v1413_v55 = vsub.f32 %v1400_v47, %v1411_v53  ;;  %v1416_v56 = vsel %vm817_vm3, %v1414_v54, 0.0 }
 0x711   : > { %1417 = vadd.xlane.f32.xlu0 %v1416_v56 }
 0x712   : > { %v1415_v34 = vmul.f32 %v1413_v55, %v1413_v55 }
 0x714   : > { %v1419_v57 = vsel %vm817_vm3, %v1415_v34, 0.0 }
 0x715   : > { %1420 = vadd.xlane.f32.xlu0 %v1419_v57 }
 0x79e   : > { %v1418_v59 = vpop.xlane.xlu0 %1417 }
 0x79f   : > { %v1422_v60 = vmul.f32 0.03125, %v1418_v59 }
 0x7a1   : > { %v1424_v61 = vadd.f32 1e-12, %v1422_v60 }
 0x7a2   : > { %v1421_v62 = vpop.xlane.xlu0 %1420 }
 0x7a3   : > { %2172 = vrsqrt.f32 %v1424_v61  ;;  %v1423_v63 = vmul.f32 0.03125, %v1421_v62  ;;  %v1961_v62 = vld [vmem:[%s730_s20] ss:$0 sm:$0xff] }
 0x7a5   : > { %v1425_v0 = vadd.f32 1e-12, %v1423_v63 }
 0x7a7   : > { %2174 = vrsqrt.f32 %v1425_v0  ;;  %v1962_v0 = vld [vmem:[%s733_s16] ss:$0 sm:$0xff] }
 0x7ad   : > { %v2173_v1 = vpop.eup %2172 }
 0x7ae   : > { %v1428_v2 = vmul.f32 %v2173_v1, %v1412_v51 }
 0x7b0   : > { %v1436_v5 = vmul.f32 %v1949_v3, %v1428_v2 }
 0x7b1   : > { %v2175_v4 = vpop.eup %2174 }
 0x7b2   : > { %v1429_v6 = vmul.f32 %v2175_v4, %v1413_v55  ;;  %v1444_v9 = vadd.f32 %v1950_v7, %v1436_v5 }
 0x7b4   : > { %v1437_v8 = vmul.f32 %v1949_v3, %v1429_v6 }
 0x7b6   : > { %v1445_v10 = vadd.f32 %v1950_v7, %v1437_v8  ;;  %v1666_v7 = vld [vmem:[%s2672_s26] sm:$0xff] (!%p1963_p5)  ;;  %v1667_v8 = vld [vmem:[%s2672_s26 + $0x8] sm:$0xff] (!%p1963_p5) }
 0x7b8   : > { %v1446_v11 = vpack.c.bf16 %v1445_v10, %v1444_v9 }
 0x7ba   : > { %2078 = vmatmul.mubr.msk.bf16.vlgmr.msra.gmra.mrb[20].mxu0 %vm817_vm3, %v1446_v11  ;;  %v2105_v11 = vpack.c.bf16 (!%p1963_p5), %v1667_v8, %v1666_v7 }
 0x7bb   : > { %2101 = vmatprep.mubr.msk.f32.mxu0 (!%p1963_p5), %vm2236_vm8, %v2237_v13 }
 0x88d   : > { %v1507_v17 = vpop.f32.mrb[20].mxu0 }
 0x88e   : > { %v1508_v18 = vadd.f32 %v1951_v16, %v1507_v17  ;;  %v2079_v19 = vpop.f32.mrb[21].mxu0  ;;  %v1964_v17 = vld [vmem:[%s2673_s22] ss:$0 sm:$0xff] (!%p1963_p5) }
 0x88f   : > { %v1510_v20 = vpop.f32.mrb[22].mxu0 }
 0x890   : > { %v1516_v21 = vmul.f32 0.70710677, %v1508_v18  ;;  %v1511_v22 = vadd.f32 %v1951_v16, %v1510_v20  ;;  %v2080_v23 = vpop.f32.mrb[23].mxu0  ;;  %v1514_v27 = vmul.f32 0.5, %v1508_v18 }
 0x892   : > { %2176 = verf.f32 %v1516_v21  ;;  %v1517_v24 = vmul.f32 0.70710677, %v1511_v22  ;;  %v1515_v28 = vmul.f32 0.5, %v1511_v22 }
 0x894   : > { %2178 = verf.f32 %v1517_v24 }
 0x89c   : > { %v2177_v25 = vpop.eup %2176 }
 0x89d   : > { %v1520_v32 = vadd.f32 1.0, %v2177_v25 }
 0x89e   : > { %v2179_v26 = vpop.eup %2178 }
 0x89f   : > { %v1521_v29 = vadd.f32 1.0, %v2179_v26  ;;  %v1522_v30 = vmul.f32 %v1520_v32, %v1514_v27 }
 0x8a1   : > { %v1523_v31 = vmul.f32 %v1521_v29, %v1515_v28 }
 0x8a3   : > { %v1524_v33 = vpack.c.bf16 %v1523_v31, %v1522_v30 }
 0x8a5   : > { %2090 = vmatmul.mubr.msk.bf16.vlgmr.msra.gmra.mrb[20].mxu1 %vm1564_vm7, %v1524_v33 }
 0x978   : > { %v1602_v37 = vpop.f32.mrb[20].mxu1 }
 0x979   : > { %v1603_v38 = vadd.f32 %v1955_v36, %v1602_v37  ;;  %v2091_v39 = vpop.f32.mrb[21].mxu1 }
 0x97a   : > { %v1605_v40 = vpop.f32.mrb[22].mxu1 }
 0x97b   : > { %v1606_v41 = vadd.f32 %v1955_v36, %v1605_v40  ;;  %v2092_v42 = vpop.f32.mrb[23].mxu1  ;;  %v1609_v43 = vadd.f32 %v1603_v38, %v1444_v9  ;;  %v1668_v9 = vld [vmem:[%s2672_s26 + $0x10] sm:$0xff] (!%p1963_p5) }
 0x97c   : > { %v2108_v14 = vpack.c.bf16 (!%p1963_p5), %v1669_v12, %v1668_v9 }
 0x97d   : > { %v1613_v44 = vsel %vm817_vm3, %v1609_v43, 0.0  ;;  %v1610_v45 = vadd.f32 %v1606_v41, %v1445_v10  ;;  %v2235_v10 = vmov (!%p1963_p5), 0.0|0.0  }
 0x97e   : > { %1614 = vadd.xlane.f32.xlu1 %v1613_v44  ;;  %2104 = vmatprep.subr.bf16.mxu0 (!%p1963_p5), %v2235_v10 }
 0x97f   : > { %v1616_v46 = vsel %vm817_vm3, %v1610_v45, 0.0  ;;  %2106 = vmatpush3.bf16.msra.mxu0 (!%p1963_p5), %v2105_v11 }
 0x980   : > { %1617 = vadd.xlane.f32.xlu0 %v1616_v46  ;;  %2107 = vmatprep.subr.bf16.mxu0 (!%p1963_p5), %v2235_v10 }
 0x983   : > { %2109 = vmatpush3.bf16.msra.mxu0 (!%p1963_p5), %v2108_v14 }
 0xa0b   : > { %v1615_v47 = vpop.xlane.xlu1 %1614 }
 0xa0c   : > { %v1619_v48 = vmul.f32 0.03125, %v1615_v47 }
 0xa0d   : > { %v1618_v49 = vpop.xlane.xlu0 %1617 }
 0xa0e   : > { %v1621_v50 = vsub.f32 %v1609_v43, %v1619_v48  ;;  %v1620_v51 = vmul.f32 0.03125, %v1618_v49 }
 0xa10   : > { %v1622_v52 = vsub.f32 %v1610_v45, %v1620_v51  ;;  %v1623_v53 = vmul.f32 %v1621_v50, %v1621_v50 }
 0xa12   : > { %v1625_v54 = vsel %vm817_vm3, %v1623_v53, 0.0  ;;  %v1624_v55 = vmul.f32 %v1622_v52, %v1622_v52 }
 0xa13   : > { %1626 = vadd.xlane.f32.xlu0 %v1625_v54 }
 0xa14   : > { %v1628_v56 = vsel %vm817_vm3, %v1624_v55, 0.0 }
 0xa17   : > { %1629 = vadd.xlane.f32.xlu0 %v1628_v56 }
 0xaa0   : > { %v1627_v34 = vpop.xlane.xlu0 %1626 }
 0xaa1   : > { %v1631_v57 = vmul.f32 0.03125, %v1627_v34 }
 0xaa3   : > { %v1633_v35 = vadd.f32 1e-12, %v1631_v57 }
 0xaa4   : > { %v1630_v58 = vpop.xlane.xlu0 %1629 }
 0xaa5   : > { %2180 = vrsqrt.f32 %v1633_v35  ;;  %v1632_v59 = vmul.f32 0.03125, %v1630_v58 }
 0xaa7   : > { %v1634_v60 = vadd.f32 1e-12, %v1632_v59 }
 0xaa9   : > { %2182 = vrsqrt.f32 %v1634_v60 }
 0xaaf   : > { %v2181_v61 = vpop.eup %2180 }
 0xab0   : > { %v1637_v63 = vmul.f32 %v2181_v61, %v1621_v50 }
 0xab2   : > { %v1645_v1 = vmul.f32 %v1961_v62, %v1637_v63 }
 0xab3   : > { %v2183_v2 = vpop.eup %2182 }
 0xab4   : > { %v1653_v3 = vadd.f32 %v1962_v0, %v1645_v1  ;;  %v1638_v4 = vmul.f32 %v2183_v2, %v1622_v52  ;;  %1660 = sbr.rel (%p1963_p5) target bundleno = 3280 (0xcd0), region = 100 }
 0xab6   : > { %1655 = vst.msk [vmem:[#allocation2] sm:$0xff] %vm817_vm3, %v1653_v3  ;;  %v1646_v5 = vmul.f32 %v1961_v62, %v1638_v4 }
 0xab8   : > { %v1654_v6 = vadd.f32 %v1962_v0, %v1646_v5 }
 0xaba   : > { %1656 = vst.msk [vmem:[#allocation2 + $0x8] sm:$0xff] %vm817_vm3, %v1654_v6  ;;  %v1662_v15 = vrot.slane (!%p1963_p5), %v1654_v6, 7 }
 0xabc   : > { %v1665_v16 = vsel %vm1664_vm9, %v1653_v3, %v1662_v15 }
 0xabd   : > { %2102 = vmatmul.mubr.msk.f32.vlgmr.msra.gmra.mrb[0].mxu0 %vm817_vm3, %v1665_v16 }
 0xb90   : > { %v1746_v18 = vpop.f32.mrb[0].mxu0 }
 0xb91   : > { %v1747_v19 = vadd.f32 %v1964_v17, %v1746_v18  ;;  %v2103_v20 = vpop.f32.mrb[1].mxu0 }
 0xb93   : > { %v1751_v21 = vsel %vm1750_vm10, %v1747_v19, -inf }
 0xb94   : > { %1752 = vmax.xlane.f32.xlu0 %v1751_v21 }
 0xc21   : > { %v1753_v22 = vpop.xlane.xlu0 %1752 }
 0xc22   : > { %v1754_v23 = vsub.f32 %v1747_v19, %v1753_v22 }
 0xc24   : > { %v1755_v24 = vmul.f32 1.442695, %v1754_v23 }
 0xc26   : > { %2184 = vpow2.f32 %v1755_v24 }
 0xc30   : > { %v2185_v25 = vpop.eup %2184 }
 0xc31   : > { %v1757_v32 = vsel %vm1750_vm10, %v2185_v25, 0.0 }
 0xc32   : > { %1758 = vadd.xlane.f32.xlu0 %v1757_v32 }
 0xcbf   : > { %v1759_v26 = vpop.xlane.xlu0 %1758 }
 0xcc0   : > { %2186 = vlog2.f32 %v1759_v26 }
 0xcca   : > { %v2187_v27 = vpop.eup %2186 }
 0xccb   : > { %v1761_v28 = vmul.f32 0.6931472, %v2187_v27 }
 0xccd   : > { %v1762_v29 = vsub.f32 %v1754_v23, %v1761_v28 }
 0xccf   : > { %1763 = vst.msk [vmem:[#allocation3] sm:$0x3] %vm1750_vm10, %v1762_v29 }
 0xcd0 PF: > { %p2114_p6 = scmp.eq.s32.totalorder %s2340_s28, 1  ;;  %s2238_s6 = smov [#allocation3]  }
 0xcd1   : > { %s1771_s27 = sshll.u32 %s2238_s6, 4  ;;  %s1772_s27 = int_to_ptr.vmem [resolvable:$true] %s1771_s27 }
 0xcd2   : > { %s2188_s0 = scalar_lea.vmem %s1772_s27, 32  ;;  %p2195_p10 = scmp.lt.s32.totalorder %s1772_s27, %s1772_s27 }
 0xcd3   : > { %p2189_p7 = scmp.ne.s32.totalorder %s1772_s27, %s2188_s0  ;;  %p2196_p11 = scmp.lt.s32.totalorder %s2188_s0, %s2188_s0 }
 0xcd5   : > { %p2190_p8 = pnand %p2189_p7, %p2114_p6  ;;  %p2197_p12 = por %p2196_p11, %p2195_p10 }
 0xcd7   : > { %p2191_p9 = pneg %p2190_p8 }
 0xcd9   : > { %p2198_p13 = pnand %p2197_p12, %p2191_p9 }
 0xcdb   : > { %2201 = shalt.err (!%p2198_p13)
}
 0xcdc   : > { %s2674_s23 = sld [smem:[#allocation15_spill]] }
 0xce2   : > { %s2202_s20 = scalar_lea.hbm %s2674_s23, 32 }
 0xce3   : > { %p2203_p0 = scmp.ne.s32.totalorder %s2674_s23, %s2202_s20  ;;  %p2208_p3 = scmp.lt.u32.totalorder %s2202_s20, %s2674_s23 }
 0xce5   : > { %p2204_p1 = pnand %p2203_p0, %p2114_p6 }
 0xce7   : > { %p2205_p2 = pneg %p2204_p1 }
 0xce9   : > { %p2210_p4 = pnand %p2208_p3, %p2205_p2 }
 0xceb   : > { %2213 = shalt.err (!%p2210_p4)
}
 0xcec   : > { %2111 = dma.vmem_to_hbm [thread:$0]  (%p2114_p6), %s1772_s27, 32, %s2674_s23, [#allocation4]  }
 0xced   : > { %2219 = dma.done.wait (%p2114_p6), [#allocation4], 32  }
 0xcee   : > { %2221 = vsyncadd (%p2114_p6), [#allocation4], 4294967264 }
 0xcef PF: > { %s2675_s18 = sld [smem:[#allocation6_spill]] }
 0xcf5   : > { %s29_s27 = sadd.s32 1, %s2675_s18  }
 0xcf6   : > { %p26_p5 = scmp.ge.s32.totalorder %s29_s27, 4  }
 0xcf8   :  { %28 = sbr.rel (!%p26_p5) target bundleno = 10 (0xa), region = 160 }
 0xcff   :  { %1784 = vsyncpa [#allocation4], 1 }
 0xd00   :  { %1786 = vsyncpa [#allocation4 + $0x1], 1 }

</bundles_post_ra>
